<compile_context>
chip_gen: v7x
topology: tpu7x:2x2x1
jax: 0.10.0
libtpu: 0.0.40
codegen_flags: <defaults>
</compile_context>

<pallas_src>
import numpy as np
import jax
import jax.numpy as jnp
from jax import lax
from jax.experimental import pallas as pl
from jax.experimental.pallas import tpu as pltpu

# ---------------- problem sizes (small, consistent with the module) ----------
N, C_IN, C_OUT, T, V = 2, 4, 16, 8, 16
COFF = 4
NUM_SUBSET = 3
IC = C_OUT // COFF                      # inter_channels = 4
K, PAD = 9, 4                           # temporal kernel (9,1), padding (4,0)
CT, ICT, OCT = C_IN * T, IC * T, C_OUT * T   # 32, 32, 128
NBR = 3 * NUM_SUBSET                    # 9 fused branch blocks per side
EPS = 1e-5


# ------------------------------- Pallas kernel -------------------------------
def gtcn_kernel(x2d_ref, xT_ref, aT_ref, wa_ref, ba_ref, wbt_ref, bbt_ref,
                wdtf_ref, wdnT_ref, bias_ref, o_ref):
    x2d = x2d_ref[0]                    # (CT, V)  = (32, 16)
    xT = xT_ref[0]                      # (V, CT)  = (16, 32)

    # All 9 "a-side" branch convs (conv_a, conv_T1, conv_ST11 x 3 subsets),
    # fused into one stacked matmul -> (9*ICT, V) = (288, 16).
    fA = jnp.dot(wa_ref[...], x2d, preferred_element_type=jnp.float32) + ba_ref[...]
    # All 9 "b-side" branch convs (conv_b, conv_T2, conv_ST12 x 3 subsets),
    # computed directly in the transposed (V, ICT) layout -> (16, 288).
    fBT = jnp.dot(xT, wbt_ref[...], preferred_element_type=jnp.float32) + bbt_ref[...]

    inv_ict = 1.0 / float(ICT)

    def attn_T(p):
        # Returns attn^T (V, V): softmax over the last axis here == softmax over
        # dim=-2 of the untransposed attention map (nn.Softmax(-2)).
        f_b_T = fBT[:, p * ICT:(p + 1) * ICT]        # (V, ICT)
        f_a = fA[p * ICT:(p + 1) * ICT, :]           # (ICT, V)
        lg = jnp.dot(f_b_T, f_a, preferred_element_type=jnp.float32) * inv_ict
        lg = lg - jnp.max(lg, axis=-1, keepdims=True)
        e = jnp.exp(lg)
        return e / jnp.sum(e, axis=-1, keepdims=True)

    # Residual / down path (1x1 conv + bn, folded) seeds the lane-dense accumulator.
    acc = jnp.dot(xT, wdnT_ref[...], preferred_element_type=jnp.float32)   # (V, OCT)

    for s in range(NUM_SUBSET):          # unrolled; accumulate in vregs
        a_comb_T = (aT_ref[s] + attn_T(3 * s) + attn_T(3 * s + 1)
                    + attn_T(3 * s + 2))                                   # (V, V)
        zT = jnp.dot(a_comb_T, xT, preferred_element_type=jnp.float32)     # (V, CT)
        # conv_d (1x1) with bn scale folded into the weight.
        acc = acc + jnp.dot(zT, wdtf_ref[s], preferred_element_type=jnp.float32)

    # Folded bias row: bn_scale*sum(conv_d bias) + bn_bias + down bias (bn-folded).
    o_ref[0] = jnp.maximum(acc + bias_ref[...], 0.0)


def unit_gtcn_7_forward(x, p):
    nb = x.shape[0]
    x2d = x.reshape(nb, CT, V).astype(jnp.float32)
    x2d_T = jnp.transpose(x2d, (0, 2, 1))
    out_T = pl.pallas_call(
        gtcn_kernel,
        out_shape=jax.ShapeDtypeStruct((nb, V, OCT), jnp.float32),
        grid_spec=pltpu.PrefetchScalarGridSpec(
            num_scalar_prefetch=0,
            grid=(nb,),
            in_specs=[
                pl.BlockSpec((1, CT, V), lambda n: (n, 0, 0)),              # x2d
                pl.BlockSpec((1, V, CT), lambda n: (n, 0, 0)),              # x2d^T
                pl.BlockSpec((NUM_SUBSET, V, V), lambda n: (0, 0, 0)),      # A^T
                pl.BlockSpec((NBR * ICT, CT), lambda n: (0, 0)),            # WA stack
                pl.BlockSpec((NBR * ICT, 1), lambda n: (0, 0)),             # BA stack
                pl.BlockSpec((CT, NBR * ICT), lambda n: (0, 0)),            # WB^T stack
                pl.BlockSpec((1, NBR * ICT), lambda n: (0, 0)),             # BB^T stack
                pl.BlockSpec((NUM_SUBSET, CT, OCT), lambda n: (0, 0, 0)),   # conv_d^T (bn-folded)
                pl.BlockSpec((CT, OCT), lambda n: (0, 0)),                  # down^T (bn-folded)
                pl.BlockSpec((1, OCT), lambda n: (0, 0)),                   # folded bias row
            ],
            out_specs=pl.BlockSpec((1, V, OCT), lambda n: (n, 0, 0)),
        ),
        compiler_params=pltpu.CompilerParams(
            dimension_semantics=("parallel",)),
    )(x2d, x2d_T, p['A_T'], p['WA'], p['BA'], p['WBT'], p['BBT'],
      p['WdTf'], p['WdownTf'], p['bias'])
    # (nb, V, OCT) -> (nb, OCT, V) -> (nb, C_OUT, T, V)
    return jnp.transpose(out_T, (0, 2, 1)).reshape(nb, C_OUT, T, V)


# ----------------------- conv -> matmul parameter lowering -------------------
def _kron_eye_T(w2):
    return np.kron(np.asarray(w2, np.float32), np.eye(T, dtype=np.float32))


def _temporal_mat(w3):
    # w3: (O, C_IN, K), "same" padding PAD.
    w3 = np.asarray(w3, np.float32)
    d = np.arange(T)[None, :] - np.arange(T)[:, None] + PAD          # (T, T)
    valid = ((d >= 0) & (d < K)).astype(np.float32)
    band = w3[:, :, np.clip(d, 0, K - 1)] * valid[None, None]        # (O, C, T, T)
    o = w3.shape[0]
    return band.transpose(0, 2, 1, 3).reshape(o * T, C_IN * T)


def _conv_as_mat(w4):
    w4 = np.asarray(w4, np.float32)
    if w4.shape[2] == 1:
        return _kron_eye_T(w4[:, :, 0, 0])
    return _temporal_mat(w4[:, :, :, 0])


def _rep_bias(b):
    return np.repeat(np.asarray(b, np.float32), T).reshape(-1, 1)


def pack_params(raw):
    a_wk, a_bk = ['wa', 'wt1', 'ws1'], ['ba', 'bt1', 'bs1']
    b_wk, b_bk = ['wb', 'wt2', 'ws2'], ['bb', 'bt2', 'bs2']

    bn_sc = np.asarray(raw['gamma']) / np.sqrt(np.asarray(raw['rvar']) + EPS)
    bn_bi = np.asarray(raw['beta']) - np.asarray(raw['rmean']) * bn_sc
    bn_sc_rep = _rep_bias(bn_sc)                          # (OCT, 1)
    bn_bi_rep = _rep_bias(bn_bi)

    wa_blk, ba_blk, wb_blk, bb_blk, wdtf_blk = [], [], [], [], []
    bd_sum = np.zeros((OCT, 1), np.float32)
    for s in range(NUM_SUBSET):
        for wk, bk in zip(a_wk, a_bk):
            wa_blk.append(_conv_as_mat(raw[wk][s]))       # (ICT, CT)
            ba_blk.append(_rep_bias(raw[bk][s]))          # (ICT, 1)
        for wk, bk in zip(b_wk, b_bk):
            wb_blk.append(_conv_as_mat(raw[wk][s]))
            bb_blk.append(_rep_bias(raw[bk][s]))
        wd = _kron_eye_T(np.asarray(raw['wd'][s])[:, :, 0, 0])       # (OCT, CT)
        wdtf_blk.append(wd.T * bn_sc_rep[:, 0][None, :])             # (CT, OCT), bn folded
        bd_sum += _rep_bias(raw['bd'][s])

    WA = np.concatenate(wa_blk, axis=0)                   # (9*ICT, CT)
    BA = np.concatenate(ba_blk, axis=0)                   # (9*ICT, 1)
    WBT = np.concatenate(wb_blk, axis=0).T                # (CT, 9*ICT)
    BBT = np.concatenate(bb_blk, axis=0).T                # (1, 9*ICT)
    WdTf = np.stack(wdtf_blk)                             # (3, CT, OCT)

    d_sc = np.asarray(raw['dgamma']) / np.sqrt(np.asarray(raw['drvar']) + EPS)
    d_bi = np.asarray(raw['dbeta']) - np.asarray(raw['drmean']) * d_sc
    wdown_f = _rep_bias(d_sc) * _kron_eye_T(np.asarray(raw['wdown'])[:, :, 0, 0])  # (OCT, CT)
    bdown_f = _rep_bias(d_sc) * _rep_bias(raw['bdown']) + _rep_bias(d_bi)          # (OCT, 1)
    final_bias = bn_sc_rep * bd_sum + bn_bi_rep + bdown_f                          # (OCT, 1)

    f32 = jnp.float32
    return dict(
        A_T=jnp.asarray(np.asarray(raw['A_total']).transpose(0, 2, 1), f32),  # (3, V, V)
        WA=jnp.asarray(WA, f32), BA=jnp.asarray(BA, f32),
        WBT=jnp.asarray(WBT, f32), BBT=jnp.asarray(BBT, f32),
        WdTf=jnp.asarray(WdTf, f32),
        WdownTf=jnp.asarray(wdown_f.T, f32),               # (CT, OCT)
        bias=jnp.asarray(final_bias.T, f32),               # (1, OCT)
    )


# ---------------------- deterministic parameter construction -----------------
def make_params():
    keys = iter(jax.random.split(jax.random.PRNGKey(0), 256))

    def nrm(shape, scale=0.2):
        return scale * jax.random.normal(next(keys), shape, dtype=jnp.float32)

    raw = {k: [] for k in ['wa', 'ba', 'wb', 'bb', 'wt1', 'bt1', 'wt2', 'bt2',
                           'ws1', 'bs1', 'ws2', 'bs2', 'wd', 'bd']}
    for i in range(NUM_SUBSET):
        raw['wa'].append(nrm((IC, C_IN, 1, 1))); raw['ba'].append(nrm((IC,), 0.1))
        raw['wb'].append(nrm((IC, C_IN, 1, 1))); raw['bb'].append(nrm((IC,), 0.1))
        raw['wt1'].append(nrm((IC, C_IN, K, 1), 0.1)); raw['bt1'].append(nrm((IC,), 0.1))
        raw['wt2'].append(nrm((IC, C_IN, K, 1), 0.1)); raw['bt2'].append(nrm((IC,), 0.1))
        # The PyTorch module appends TWO convs per subset to conv_ST11/conv_ST12 but
        # forward only indexes [0..2]: subsets 0 and 2 use the 1x1 conv, subset 1 the
        # (9,1) temporal conv. Reproduced faithfully here.
        if i == 1:
            raw['ws1'].append(nrm((IC, C_IN, K, 1), 0.1))
            raw['ws2'].append(nrm((IC, C_IN, K, 1), 0.1))
        else:
            raw['ws1'].append(nrm((IC, C_IN, 1, 1)))
            raw['ws2'].append(nrm((IC, C_IN, 1, 1)))
        raw['bs1'].append(nrm((IC,), 0.1)); raw['bs2'].append(nrm((IC,), 0.1))
        raw['wd'].append(nrm((C_OUT, C_IN, 1, 1))); raw['bd'].append(nrm((C_OUT,), 0.1))
    raw['wdown'] = nrm((C_OUT, C_IN, 1, 1)); raw['bdown'] = nrm((C_OUT,), 0.1)
    # BatchNorm params (module inits gamma=1e-6 / 1; use nontrivial deterministic
    # values so the correctness check exercises all paths).
    raw['gamma'] = 0.5 + jax.random.uniform(next(keys), (C_OUT,), dtype=jnp.float32)
    raw['beta'] = nrm((C_OUT,), 0.1)
    raw['rmean'] = nrm((C_OUT,), 0.1)
    raw['rvar'] = 0.5 + jax.random.uniform(next(keys), (C_OUT,), dtype=jnp.float32)
    raw['dgamma'] = 0.5 + jax.random.uniform(next(keys), (C_OUT,), dtype=jnp.float32)
    raw['dbeta'] = nrm((C_OUT,), 0.1)
    raw['drmean'] = nrm((C_OUT,), 0.1)
    raw['drvar'] = 0.5 + jax.random.uniform(next(keys), (C_OUT,), dtype=jnp.float32)
    # adjacency A (constructor arg) and PA (nn.Parameter, init constant 1e-6)
    a = jax.random.uniform(next(keys), (NUM_SUBSET, V, V), dtype=jnp.float32, maxval=0.5)
    pa = jnp.full((NUM_SUBSET, V, V), 1e-6, jnp.float32)
    eye = jnp.eye(V, dtype=jnp.float32)
    a_ch4s = jax.nn.softmax((8 * a**4 - 4 * a**2 - 4 * a + eye) / V, axis=-2)
    a_ch3 = 4 * a**2 - a - 2 * eye
    raw['A_total'] = a_ch3 + a_ch4s + pa                       # A[i] used in forward
    raw['x'] = jax.random.normal(next(keys), (N, C_IN, T, V), dtype=jnp.float32)
    return raw


# --------------------------- plain-JAX reference ------------------------------
def _conv2d(x, w, b, pad_t):
    out = lax.conv_general_dilated(
        x, w, window_strides=(1, 1), padding=((pad_t, pad_t), (0, 0)),
        dimension_numbers=('NCHW', 'OIHW', 'NCHW'),
        precision=lax.Precision.HIGHEST)
    return out + b[None, :, None, None]


def reference_forward(x, raw):
    # TODO(synk): BatchNorms are evaluated in inference mode (running stats);
    # PyTorch training-mode batch statistics are not reproduced.
    nb = x.shape[0]
    hp = lax.Precision.HIGHEST
    y = None
    for i in range(NUM_SUBSET):
        def att(f1, f2):
            a1 = jnp.transpose(f1, (0, 3, 1, 2)).reshape(nb, V, ICT)
            a2 = f2.reshape(nb, ICT, V)
            return jax.nn.softmax(jnp.matmul(a1, a2, precision=hp) / ICT, axis=-2)
        pad_s = PAD if i == 1 else 0
        fa = _conv2d(x, raw['wa'][i], raw['ba'][i], 0)
        fb = _conv2d(x, raw['wb'][i], raw['bb'][i], 0)
        ft1 = _conv2d(x, raw['wt1'][i], raw['bt1'][i], PAD)
        ft2 = _conv2d(x, raw['wt2'][i], raw['bt2'][i], PAD)
        fs1 = _conv2d(x, raw['ws1'][i], raw['bs1'][i], pad_s)
        fs2 = _conv2d(x, raw['ws2'][i], raw['bs2'][i], pad_s)
        ai = raw['A_total'][i] + att(fa, fb) + att(ft1, ft2) + att(fs1, fs2)
        z = jnp.matmul(x.reshape(nb, CT, V), ai, precision=hp).reshape(nb, C_IN, T, V)
        zi = _conv2d(z, raw['wd'][i], raw['bd'][i], 0)
        y = zi if y is None else y + zi
    bnsc = raw['gamma'] / jnp.sqrt(raw['rvar'] + EPS)
    bnbi = raw['beta'] - raw['rmean'] * bnsc
    y = y * bnsc[None, :, None, None] + bnbi[None, :, None, None]
    dsc = raw['dgamma'] / jnp.sqrt(raw['drvar'] + EPS)
    dbi = raw['dbeta'] - raw['drmean'] * dsc
    dwn = _conv2d(x, raw['wdown'], raw['bdown'], 0)
    dwn = dwn * dsc[None, :, None, None] + dbi[None, :, None, None]
    return jnp.maximum(y + dwn, 0.0)


# ------------------------------------ main ------------------------------------
if __name__ == "__main__":
    raw = make_params()
    packed = pack_params(raw)
    x = raw['x']                                    # (N, C, T, V) = (2, 4, 8, 16)

    out = unit_gtcn_7_forward(x, packed)
    out = jax.block_until_ready(out)

    ref = reference_forward(x, raw)
    np.testing.assert_allclose(np.asarray(out), np.asarray(ref),
                               rtol=1e-3, atol=1e-3)
    print("KERNEL_OK")
</pallas_src>

<mosaic_0001>
module attributes {stable_mosaic.version = 11 : i64} {
  func.func @gtcn_kernel(%arg0: i32, %arg1: memref<1x32x16xf32, #tpu.memory_space<vmem>>, %arg2: memref<1x16x32xf32, #tpu.memory_space<vmem>>, %arg3: memref<3x16x16xf32, #tpu.memory_space<vmem>>, %arg4: memref<288x32xf32, #tpu.memory_space<vmem>>, %arg5: memref<288x1xf32, #tpu.memory_space<vmem>>, %arg6: memref<32x288xf32, #tpu.memory_space<vmem>>, %arg7: memref<1x288xf32, #tpu.memory_space<vmem>>, %arg8: memref<3x32x128xf32, #tpu.memory_space<vmem>>, %arg9: memref<32x128xf32, #tpu.memory_space<vmem>>, %arg10: memref<1x128xf32, #tpu.memory_space<vmem>>, %arg11: memref<1x16x128xf32, #tpu.memory_space<vmem>>) attributes {dimension_semantics = [#tpu.dimension_semantics<parallel>], iteration_bounds = array<i64: 2>, scalar_prefetch = 0 : i64, scratch_operands = 0 : i64, tpu.core_type = #tpu.core_type<tc>, window_params = [{transform_indices = @transform_0, window_bounds = array<i64: 1, 32, 16>}, {transform_indices = @transform_1, window_bounds = array<i64: 1, 16, 32>}, {pipeline_mode = #tpu.pipeline_mode<synchronous>, transform_indices = @transform_2, window_bounds = array<i64: 3, 16, 16>}, {pipeline_mode = #tpu.pipeline_mode<synchronous>, transform_indices = @transform_3, window_bounds = array<i64: 288, 32>}, {pipeline_mode = #tpu.pipeline_mode<synchronous>, transform_indices = @transform_4, window_bounds = array<i64: 288, 1>}, {pipeline_mode = #tpu.pipeline_mode<synchronous>, transform_indices = @transform_5, window_bounds = array<i64: 32, 288>}, {pipeline_mode = #tpu.pipeline_mode<synchronous>, transform_indices = @transform_6, window_bounds = array<i64: 1, 288>}, {pipeline_mode = #tpu.pipeline_mode<synchronous>, transform_indices = @transform_7, window_bounds = array<i64: 3, 32, 128>}, {pipeline_mode = #tpu.pipeline_mode<synchronous>, transform_indices = @transform_8, window_bounds = array<i64: 32, 128>}, {pipeline_mode = #tpu.pipeline_mode<synchronous>, transform_indices = @transform_9, window_bounds = array<i64: 1, 128>}, {transform_indices = @transform_10, window_bounds = array<i64: 1, 16, 128>}]} {
    %c0 = arith.constant 0 : index
    %c0_0 = arith.constant 0 : index
    %c0_1 = arith.constant 0 : index
    %0 = vector.load %arg1[%c0, %c0_0, %c0_1] : memref<1x32x16xf32, #tpu.memory_space<vmem>>, vector<1x32x16xf32>
    %1 = vector.shape_cast %0 : vector<1x32x16xf32> to vector<32x16xf32>
    %c0_2 = arith.constant 0 : index
    %c0_3 = arith.constant 0 : index
    %c0_4 = arith.constant 0 : index
    %2 = vector.load %arg2[%c0_2, %c0_3, %c0_4] : memref<1x16x32xf32, #tpu.memory_space<vmem>>, vector<1x16x32xf32>
    %3 = vector.shape_cast %2 : vector<1x16x32xf32> to vector<16x32xf32>
    %c0_5 = arith.constant 0 : index
    %c0_6 = arith.constant 0 : index
    %4 = vector.load %arg4[%c0_5, %c0_6] : memref<288x32xf32, #tpu.memory_space<vmem>>, vector<288x32xf32>
    %cst = arith.constant dense<0.000000e+00> : vector<288x16xf32>
    %5 = tpu.matmul %4, %1, %cst {dimension_numbers = #tpu.dot_dimension_numbers<[1], [0], [0], [1], [0, 0, 1, 1], [], []>} : vector<288x32xf32>, vector<32x16xf32>, vector<288x16xf32> -> vector<288x16xf32>
    %c0_7 = arith.constant 0 : index
    %c0_8 = arith.constant 0 : index
    %6 = vector.load %arg5[%c0_7, %c0_8] : memref<288x1xf32, #tpu.memory_space<vmem>>, vector<288x1xf32>
    %7 = vector.broadcast %6 : vector<288x1xf32> to vector<288x16xf32>
    %8 = arith.addf %5, %7 : vector<288x16xf32>
    %c0_9 = arith.constant 0 : index
    %c0_10 = arith.constant 0 : index
    %9 = vector.load %arg6[%c0_9, %c0_10] : memref<32x288xf32, #tpu.memory_space<vmem>>, vector<32x288xf32>
    %cst_11 = arith.constant dense<0.000000e+00> : vector<16x288xf32>
    %10 = tpu.matmul %3, %9, %cst_11 {dimension_numbers = #tpu.dot_dimension_numbers<[1], [0], [0], [1], [0, 0, 1, 1], [], []>} : vector<16x32xf32>, vector<32x288xf32>, vector<16x288xf32> -> vector<16x288xf32>
    %c0_12 = arith.constant 0 : index
    %c0_13 = arith.constant 0 : index
    %11 = vector.load %arg7[%c0_12, %c0_13] : memref<1x288xf32, #tpu.memory_space<vmem>>, vector<1x288xf32>
    %12 = vector.broadcast %11 : vector<1x288xf32> to vector<16x288xf32>
    %13 = arith.addf %10, %12 : vector<16x288xf32>
    %c0_14 = arith.constant 0 : index
    %c0_15 = arith.constant 0 : index
    %14 = vector.load %arg9[%c0_14, %c0_15] : memref<32x128xf32, #tpu.memory_space<vmem>>, vector<32x128xf32>
    %cst_16 = arith.constant dense<0.000000e+00> : vector<16x128xf32>
    %15 = tpu.matmul %3, %14, %cst_16 {dimension_numbers = #tpu.dot_dimension_numbers<[1], [0], [0], [1], [0, 0, 1, 1], [], []>} : vector<16x32xf32>, vector<32x128xf32>, vector<16x128xf32> -> vector<16x128xf32>
    %c0_17 = arith.constant 0 : index
    %c0_18 = arith.constant 0 : index
    %c0_19 = arith.constant 0 : index
    %16 = vector.load %arg3[%c0_17, %c0_18, %c0_19] : memref<3x16x16xf32, #tpu.memory_space<vmem>>, vector<1x16x16xf32>
    %17 = vector.shape_cast %16 : vector<1x16x16xf32> to vector<16x16xf32>
    %18 = vector.extract_strided_slice %13 {offsets = [0, 0], sizes = [16, 32], strides = [1, 1]} : vector<16x288xf32> to vector<16x32xf32>
    %19 = vector.extract_strided_slice %8 {offsets = [0, 0], sizes = [32, 16], strides = [1, 1]} : vector<288x16xf32> to vector<32x16xf32>
    %cst_20 = arith.constant dense<0.000000e+00> : vector<16x16xf32>
    %20 = tpu.matmul %18, %19, %cst_20 {dimension_numbers = #tpu.dot_dimension_numbers<[1], [0], [0], [1], [0, 0, 1, 1], [], []>} : vector<16x32xf32>, vector<32x16xf32>, vector<16x16xf32> -> vector<16x16xf32>
    %cst_21 = arith.constant 3.125000e-02 : f32
    %21 = vector.broadcast %cst_21 : f32 to vector<16x16xf32>
    %22 = arith.mulf %20, %21 : vector<16x16xf32>
    %cst_22 = arith.constant dense<0xFF800000> : vector<16xf32>
    %23 = vector.multi_reduction <maximumf>, %22, %cst_22 [1] : vector<16x16xf32> to vector<16xf32>
    %24 = vector.shape_cast %23 : vector<16xf32> to vector<16x1xf32>
    %25 = vector.broadcast %24 : vector<16x1xf32> to vector<16x16xf32>
    %26 = arith.subf %22, %25 : vector<16x16xf32>
    %27 = math.exp %26 : vector<16x16xf32>
    %cst_23 = arith.constant dense<0.000000e+00> : vector<16xf32>
    %28 = vector.multi_reduction <add>, %27, %cst_23 [1] : vector<16x16xf32> to vector<16xf32>
    %29 = vector.shape_cast %28 : vector<16xf32> to vector<16x1xf32>
    %30 = vector.broadcast %29 : vector<16x1xf32> to vector<16x16xf32>
    %31 = arith.divf %27, %30 : vector<16x16xf32>
    %32 = arith.addf %17, %31 : vector<16x16xf32>
    %33 = vector.extract_strided_slice %13 {offsets = [0, 32], sizes = [16, 32], strides = [1, 1]} : vector<16x288xf32> to vector<16x32xf32>
    %34 = vector.extract_strided_slice %8 {offsets = [32, 0], sizes = [32, 16], strides = [1, 1]} : vector<288x16xf32> to vector<32x16xf32>
    %cst_24 = arith.constant dense<0.000000e+00> : vector<16x16xf32>
    %35 = tpu.matmul %33, %34, %cst_24 {dimension_numbers = #tpu.dot_dimension_numbers<[1], [0], [0], [1], [0, 0, 1, 1], [], []>} : vector<16x32xf32>, vector<32x16xf32>, vector<16x16xf32> -> vector<16x16xf32>
    %cst_25 = arith.constant 3.125000e-02 : f32
    %36 = vector.broadcast %cst_25 : f32 to vector<16x16xf32>
    %37 = arith.mulf %35, %36 : vector<16x16xf32>
    %cst_26 = arith.constant dense<0xFF800000> : vector<16xf32>
    %38 = vector.multi_reduction <maximumf>, %37, %cst_26 [1] : vector<16x16xf32> to vector<16xf32>
    %39 = vector.shape_cast %38 : vector<16xf32> to vector<16x1xf32>
    %40 = vector.broadcast %39 : vector<16x1xf32> to vector<16x16xf32>
    %41 = arith.subf %37, %40 : vector<16x16xf32>
    %42 = math.exp %41 : vector<16x16xf32>
    %cst_27 = arith.constant dense<0.000000e+00> : vector<16xf32>
    %43 = vector.multi_reduction <add>, %42, %cst_27 [1] : vector<16x16xf32> to vector<16xf32>
    %44 = vector.shape_cast %43 : vector<16xf32> to vector<16x1xf32>
    %45 = vector.broadcast %44 : vector<16x1xf32> to vector<16x16xf32>
    %46 = arith.divf %42, %45 : vector<16x16xf32>
    %47 = arith.addf %32, %46 : vector<16x16xf32>
    %48 = vector.extract_strided_slice %13 {offsets = [0, 64], sizes = [16, 32], strides = [1, 1]} : vector<16x288xf32> to vector<16x32xf32>
    %49 = vector.extract_strided_slice %8 {offsets = [64, 0], sizes = [32, 16], strides = [1, 1]} : vector<288x16xf32> to vector<32x16xf32>
    %cst_28 = arith.constant dense<0.000000e+00> : vector<16x16xf32>
    %50 = tpu.matmul %48, %49, %cst_28 {dimension_numbers = #tpu.dot_dimension_numbers<[1], [0], [0], [1], [0, 0, 1, 1], [], []>} : vector<16x32xf32>, vector<32x16xf32>, vector<16x16xf32> -> vector<16x16xf32>
    %cst_29 = arith.constant 3.125000e-02 : f32
    %51 = vector.broadcast %cst_29 : f32 to vector<16x16xf32>
    %52 = arith.mulf %50, %51 : vector<16x16xf32>
    %cst_30 = arith.constant dense<0xFF800000> : vector<16xf32>
    %53 = vector.multi_reduction <maximumf>, %52, %cst_30 [1] : vector<16x16xf32> to vector<16xf32>
    %54 = vector.shape_cast %53 : vector<16xf32> to vector<16x1xf32>
    %55 = vector.broadcast %54 : vector<16x1xf32> to vector<16x16xf32>
    %56 = arith.subf %52, %55 : vector<16x16xf32>
    %57 = math.exp %56 : vector<16x16xf32>
    %cst_31 = arith.constant dense<0.000000e+00> : vector<16xf32>
    %58 = vector.multi_reduction <add>, %57, %cst_31 [1] : vector<16x16xf32> to vector<16xf32>
    %59 = vector.shape_cast %58 : vector<16xf32> to vector<16x1xf32>
    %60 = vector.broadcast %59 : vector<16x1xf32> to vector<16x16xf32>
    %61 = arith.divf %57, %60 : vector<16x16xf32>
    %62 = arith.addf %47, %61 : vector<16x16xf32>
    %cst_32 = arith.constant dense<0.000000e+00> : vector<16x32xf32>
    %63 = tpu.matmul %62, %3, %cst_32 {dimension_numbers = #tpu.dot_dimension_numbers<[1], [0], [0], [1], [0, 0, 1, 1], [], []>} : vector<16x16xf32>, vector<16x32xf32>, vector<16x32xf32> -> vector<16x32xf32>
    %c0_33 = arith.constant 0 : index
    %c0_34 = arith.constant 0 : index
    %c0_35 = arith.constant 0 : index
    %64 = vector.load %arg8[%c0_33, %c0_34, %c0_35] : memref<3x32x128xf32, #tpu.memory_space<vmem>>, vector<1x32x128xf32>
    %65 = vector.shape_cast %64 : vector<1x32x128xf32> to vector<32x128xf32>
    %cst_36 = arith.constant dense<0.000000e+00> : vector<16x128xf32>
    %66 = tpu.matmul %63, %65, %cst_36 {dimension_numbers = #tpu.dot_dimension_numbers<[1], [0], [0], [1], [0, 0, 1, 1], [], []>} : vector<16x32xf32>, vector<32x128xf32>, vector<16x128xf32> -> vector<16x128xf32>
    %67 = arith.addf %15, %66 : vector<16x128xf32>
    %c1 = arith.constant 1 : index
    %c0_37 = arith.constant 0 : index
    %c0_38 = arith.constant 0 : index
    %68 = vector.load %arg3[%c1, %c0_37, %c0_38] : memref<3x16x16xf32, #tpu.memory_space<vmem>>, vector<1x16x16xf32>
    %69 = vector.shape_cast %68 : vector<1x16x16xf32> to vector<16x16xf32>
    %70 = vector.extract_strided_slice %13 {offsets = [0, 96], sizes = [16, 32], strides = [1, 1]} : vector<16x288xf32> to vector<16x32xf32>
    %71 = vector.extract_strided_slice %8 {offsets = [96, 0], sizes = [32, 16], strides = [1, 1]} : vector<288x16xf32> to vector<32x16xf32>
    %cst_39 = arith.constant dense<0.000000e+00> : vector<16x16xf32>
    %72 = tpu.matmul %70, %71, %cst_39 {dimension_numbers = #tpu.dot_dimension_numbers<[1], [0], [0], [1], [0, 0, 1, 1], [], []>} : vector<16x32xf32>, vector<32x16xf32>, vector<16x16xf32> -> vector<16x16xf32>
    %cst_40 = arith.constant 3.125000e-02 : f32
    %73 = vector.broadcast %cst_40 : f32 to vector<16x16xf32>
    %74 = arith.mulf %72, %73 : vector<16x16xf32>
    %cst_41 = arith.constant dense<0xFF800000> : vector<16xf32>
    %75 = vector.multi_reduction <maximumf>, %74, %cst_41 [1] : vector<16x16xf32> to vector<16xf32>
    %76 = vector.shape_cast %75 : vector<16xf32> to vector<16x1xf32>
    %77 = vector.broadcast %76 : vector<16x1xf32> to vector<16x16xf32>
    %78 = arith.subf %74, %77 : vector<16x16xf32>
    %79 = math.exp %78 : vector<16x16xf32>
    %cst_42 = arith.constant dense<0.000000e+00> : vector<16xf32>
    %80 = vector.multi_reduction <add>, %79, %cst_42 [1] : vector<16x16xf32> to vector<16xf32>
    %81 = vector.shape_cast %80 : vector<16xf32> to vector<16x1xf32>
    %82 = vector.broadcast %81 : vector<16x1xf32> to vector<16x16xf32>
    %83 = arith.divf %79, %82 : vector<16x16xf32>
    %84 = arith.addf %69, %83 : vector<16x16xf32>
    %85 = vector.extract_strided_slice %13 {offsets = [0, 128], sizes = [16, 32], strides = [1, 1]} : vector<16x288xf32> to vector<16x32xf32>
    %86 = vector.extract_strided_slice %8 {offsets = [128, 0], sizes = [32, 16], strides = [1, 1]} : vector<288x16xf32> to vector<32x16xf32>
    %cst_43 = arith.constant dense<0.000000e+00> : vector<16x16xf32>
    %87 = tpu.matmul %85, %86, %cst_43 {dimension_numbers = #tpu.dot_dimension_numbers<[1], [0], [0], [1], [0, 0, 1, 1], [], []>} : vector<16x32xf32>, vector<32x16xf32>, vector<16x16xf32> -> vector<16x16xf32>
    %cst_44 = arith.constant 3.125000e-02 : f32
    %88 = vector.broadcast %cst_44 : f32 to vector<16x16xf32>
    %89 = arith.mulf %87, %88 : vector<16x16xf32>
    %cst_45 = arith.constant dense<0xFF800000> : vector<16xf32>
    %90 = vector.multi_reduction <maximumf>, %89, %cst_45 [1] : vector<16x16xf32> to vector<16xf32>
    %91 = vector.shape_cast %90 : vector<16xf32> to vector<16x1xf32>
    %92 = vector.broadcast %91 : vector<16x1xf32> to vector<16x16xf32>
    %93 = arith.subf %89, %92 : vector<16x16xf32>
    %94 = math.exp %93 : vector<16x16xf32>
    %cst_46 = arith.constant dense<0.000000e+00> : vector<16xf32>
    %95 = vector.multi_reduction <add>, %94, %cst_46 [1] : vector<16x16xf32> to vector<16xf32>
    %96 = vector.shape_cast %95 : vector<16xf32> to vector<16x1xf32>
    %97 = vector.broadcast %96 : vector<16x1xf32> to vector<16x16xf32>
    %98 = arith.divf %94, %97 : vector<16x16xf32>
    %99 = arith.addf %84, %98 : vector<16x16xf32>
    %100 = vector.extract_strided_slice %13 {offsets = [0, 160], sizes = [16, 32], strides = [1, 1]} : vector<16x288xf32> to vector<16x32xf32>
    %101 = vector.extract_strided_slice %8 {offsets = [160, 0], sizes = [32, 16], strides = [1, 1]} : vector<288x16xf32> to vector<32x16xf32>
    %cst_47 = arith.constant dense<0.000000e+00> : vector<16x16xf32>
    %102 = tpu.matmul %100, %101, %cst_47 {dimension_numbers = #tpu.dot_dimension_numbers<[1], [0], [0], [1], [0, 0, 1, 1], [], []>} : vector<16x32xf32>, vector<32x16xf32>, vector<16x16xf32> -> vector<16x16xf32>
    %cst_48 = arith.constant 3.125000e-02 : f32
    %103 = vector.broadcast %cst_48 : f32 to vector<16x16xf32>
    %104 = arith.mulf %102, %103 : vector<16x16xf32>
    %cst_49 = arith.constant dense<0xFF800000> : vector<16xf32>
    %105 = vector.multi_reduction <maximumf>, %104, %cst_49 [1] : vector<16x16xf32> to vector<16xf32>
    %106 = vector.shape_cast %105 : vector<16xf32> to vector<16x1xf32>
    %107 = vector.broadcast %106 : vector<16x1xf32> to vector<16x16xf32>
    %108 = arith.subf %104, %107 : vector<16x16xf32>
    %109 = math.exp %108 : vector<16x16xf32>
    %cst_50 = arith.constant dense<0.000000e+00> : vector<16xf32>
    %110 = vector.multi_reduction <add>, %109, %cst_50 [1] : vector<16x16xf32> to vector<16xf32>
    %111 = vector.shape_cast %110 : vector<16xf32> to vector<16x1xf32>
    %112 = vector.broadcast %111 : vector<16x1xf32> to vector<16x16xf32>
    %113 = arith.divf %109, %112 : vector<16x16xf32>
    %114 = arith.addf %99, %113 : vector<16x16xf32>
    %cst_51 = arith.constant dense<0.000000e+00> : vector<16x32xf32>
    %115 = tpu.matmul %114, %3, %cst_51 {dimension_numbers = #tpu.dot_dimension_numbers<[1], [0], [0], [1], [0, 0, 1, 1], [], []>} : vector<16x16xf32>, vector<16x32xf32>, vector<16x32xf32> -> vector<16x32xf32>
    %c1_52 = arith.constant 1 : index
    %c0_53 = arith.constant 0 : index
    %c0_54 = arith.constant 0 : index
    %116 = vector.load %arg8[%c1_52, %c0_53, %c0_54] : memref<3x32x128xf32, #tpu.memory_space<vmem>>, vector<1x32x128xf32>
    %117 = vector.shape_cast %116 : vector<1x32x128xf32> to vector<32x128xf32>
    %cst_55 = arith.constant dense<0.000000e+00> : vector<16x128xf32>
    %118 = tpu.matmul %115, %117, %cst_55 {dimension_numbers = #tpu.dot_dimension_numbers<[1], [0], [0], [1], [0, 0, 1, 1], [], []>} : vector<16x32xf32>, vector<32x128xf32>, vector<16x128xf32> -> vector<16x128xf32>
    %119 = arith.addf %67, %118 : vector<16x128xf32>
    %c2 = arith.constant 2 : index
    %c0_56 = arith.constant 0 : index
    %c0_57 = arith.constant 0 : index
    %120 = vector.load %arg3[%c2, %c0_56, %c0_57] : memref<3x16x16xf32, #tpu.memory_space<vmem>>, vector<1x16x16xf32>
    %121 = vector.shape_cast %120 : vector<1x16x16xf32> to vector<16x16xf32>
    %122 = vector.extract_strided_slice %13 {offsets = [0, 192], sizes = [16, 32], strides = [1, 1]} : vector<16x288xf32> to vector<16x32xf32>
    %123 = vector.extract_strided_slice %8 {offsets = [192, 0], sizes = [32, 16], strides = [1, 1]} : vector<288x16xf32> to vector<32x16xf32>
    %cst_58 = arith.constant dense<0.000000e+00> : vector<16x16xf32>
    %124 = tpu.matmul %122, %123, %cst_58 {dimension_numbers = #tpu.dot_dimension_numbers<[1], [0], [0], [1], [0, 0, 1, 1], [], []>} : vector<16x32xf32>, vector<32x16xf32>, vector<16x16xf32> -> vector<16x16xf32>
    %cst_59 = arith.constant 3.125000e-02 : f32
    %125 = vector.broadcast %cst_59 : f32 to vector<16x16xf32>
    %126 = arith.mulf %124, %125 : vector<16x16xf32>
    %cst_60 = arith.constant dense<0xFF800000> : vector<16xf32>
    %127 = vector.multi_reduction <maximumf>, %126, %cst_60 [1] : vector<16x16xf32> to vector<16xf32>
    %128 = vector.shape_cast %127 : vector<16xf32> to vector<16x1xf32>
    %129 = vector.broadcast %128 : vector<16x1xf32> to vector<16x16xf32>
    %130 = arith.subf %126, %129 : vector<16x16xf32>
    %131 = math.exp %130 : vector<16x16xf32>
    %cst_61 = arith.constant dense<0.000000e+00> : vector<16xf32>
    %132 = vector.multi_reduction <add>, %131, %cst_61 [1] : vector<16x16xf32> to vector<16xf32>
    %133 = vector.shape_cast %132 : vector<16xf32> to vector<16x1xf32>
    %134 = vector.broadcast %133 : vector<16x1xf32> to vector<16x16xf32>
    %135 = arith.divf %131, %134 : vector<16x16xf32>
    %136 = arith.addf %121, %135 : vector<16x16xf32>
    %137 = vector.extract_strided_slice %13 {offsets = [0, 224], sizes = [16, 32], strides = [1, 1]} : vector<16x288xf32> to vector<16x32xf32>
    %138 = vector.extract_strided_slice %8 {offsets = [224, 0], sizes = [32, 16], strides = [1, 1]} : vector<288x16xf32> to vector<32x16xf32>
    %cst_62 = arith.constant dense<0.000000e+00> : vector<16x16xf32>
    %139 = tpu.matmul %137, %138, %cst_62 {dimension_numbers = #tpu.dot_dimension_numbers<[1], [0], [0], [1], [0, 0, 1, 1], [], []>} : vector<16x32xf32>, vector<32x16xf32>, vector<16x16xf32> -> vector<16x16xf32>
    %cst_63 = arith.constant 3.125000e-02 : f32
    %140 = vector.broadcast %cst_63 : f32 to vector<16x16xf32>
    %141 = arith.mulf %139, %140 : vector<16x16xf32>
    %cst_64 = arith.constant dense<0xFF800000> : vector<16xf32>
    %142 = vector.multi_reduction <maximumf>, %141, %cst_64 [1] : vector<16x16xf32> to vector<16xf32>
    %143 = vector.shape_cast %142 : vector<16xf32> to vector<16x1xf32>
    %144 = vector.broadcast %143 : vector<16x1xf32> to vector<16x16xf32>
    %145 = arith.subf %141, %144 : vector<16x16xf32>
    %146 = math.exp %145 : vector<16x16xf32>
    %cst_65 = arith.constant dense<0.000000e+00> : vector<16xf32>
    %147 = vector.multi_reduction <add>, %146, %cst_65 [1] : vector<16x16xf32> to vector<16xf32>
    %148 = vector.shape_cast %147 : vector<16xf32> to vector<16x1xf32>
    %149 = vector.broadcast %148 : vector<16x1xf32> to vector<16x16xf32>
    %150 = arith.divf %146, %149 : vector<16x16xf32>
    %151 = arith.addf %136, %150 : vector<16x16xf32>
    %152 = vector.extract_strided_slice %13 {offsets = [0, 256], sizes = [16, 32], strides = [1, 1]} : vector<16x288xf32> to vector<16x32xf32>
    %153 = vector.extract_strided_slice %8 {offsets = [256, 0], sizes = [32, 16], strides = [1, 1]} : vector<288x16xf32> to vector<32x16xf32>
    %cst_66 = arith.constant dense<0.000000e+00> : vector<16x16xf32>
    %154 = tpu.matmul %152, %153, %cst_66 {dimension_numbers = #tpu.dot_dimension_numbers<[1], [0], [0], [1], [0, 0, 1, 1], [], []>} : vector<16x32xf32>, vector<32x16xf32>, vector<16x16xf32> -> vector<16x16xf32>
    %cst_67 = arith.constant 3.125000e-02 : f32
    %155 = vector.broadcast %cst_67 : f32 to vector<16x16xf32>
    %156 = arith.mulf %154, %155 : vector<16x16xf32>
    %cst_68 = arith.constant dense<0xFF800000> : vector<16xf32>
    %157 = vector.multi_reduction <maximumf>, %156, %cst_68 [1] : vector<16x16xf32> to vector<16xf32>
    %158 = vector.shape_cast %157 : vector<16xf32> to vector<16x1xf32>
    %159 = vector.broadcast %158 : vector<16x1xf32> to vector<16x16xf32>
    %160 = arith.subf %156, %159 : vector<16x16xf32>
    %161 = math.exp %160 : vector<16x16xf32>
    %cst_69 = arith.constant dense<0.000000e+00> : vector<16xf32>
    %162 = vector.multi_reduction <add>, %161, %cst_69 [1] : vector<16x16xf32> to vector<16xf32>
    %163 = vector.shape_cast %162 : vector<16xf32> to vector<16x1xf32>
    %164 = vector.broadcast %163 : vector<16x1xf32> to vector<16x16xf32>
    %165 = arith.divf %161, %164 : vector<16x16xf32>
    %166 = arith.addf %151, %165 : vector<16x16xf32>
    %cst_70 = arith.constant dense<0.000000e+00> : vector<16x32xf32>
    %167 = tpu.matmul %166, %3, %cst_70 {dimension_numbers = #tpu.dot_dimension_numbers<[1], [0], [0], [1], [0, 0, 1, 1], [], []>} : vector<16x16xf32>, vector<16x32xf32>, vector<16x32xf32> -> vector<16x32xf32>
    %c2_71 = arith.constant 2 : index
    %c0_72 = arith.constant 0 : index
    %c0_73 = arith.constant 0 : index
    %168 = vector.load %arg8[%c2_71, %c0_72, %c0_73] : memref<3x32x128xf32, #tpu.memory_space<vmem>>, vector<1x32x128xf32>
    %169 = vector.shape_cast %168 : vector<1x32x128xf32> to vector<32x128xf32>
    %cst_74 = arith.constant dense<0.000000e+00> : vector<16x128xf32>
    %170 = tpu.matmul %167, %169, %cst_74 {dimension_numbers = #tpu.dot_dimension_numbers<[1], [0], [0], [1], [0, 0, 1, 1], [], []>} : vector<16x32xf32>, vector<32x128xf32>, vector<16x128xf32> -> vector<16x128xf32>
    %171 = arith.addf %119, %170 : vector<16x128xf32>
    %c0_75 = arith.constant 0 : index
    %c0_76 = arith.constant 0 : index
    %172 = vector.load %arg10[%c0_75, %c0_76] : memref<1x128xf32, #tpu.memory_space<vmem>>, vector<1x128xf32>
    %173 = vector.broadcast %172 : vector<1x128xf32> to vector<16x128xf32>
    %174 = arith.addf %171, %173 : vector<16x128xf32>
    %cst_77 = arith.constant 0.000000e+00 : f32
    %175 = vector.broadcast %cst_77 : f32 to vector<16x128xf32>
    %176 = arith.maximumf %174, %175 : vector<16x128xf32>
    %c0_78 = arith.constant 0 : index
    %c0_79 = arith.constant 0 : index
    %c0_80 = arith.constant 0 : index
    %177 = vector.load %arg11[%c0_78, %c0_79, %c0_80] : memref<1x16x128xf32, #tpu.memory_space<vmem>>, vector<1x16x128xf32>
    %178 = vector.shape_cast %177 : vector<1x16x128xf32> to vector<16x128xf32>
    %179 = vector.shape_cast %176 : vector<16x128xf32> to vector<1x16x128xf32>
    tpu.vector_store %arg11[%c0_78, %c0_79, %c0_80], %179 {strides = array<i32>} : memref<1x16x128xf32, #tpu.memory_space<vmem>>, vector<1x16x128xf32>,
    return
  }
  func.func @transform_0(%arg0: i32) -> (i32, i32, i32) {
    %c0_i32 = arith.constant 0 : i32
    %c0_i32_0 = arith.constant 0 : i32
    %c0_i32_1 = arith.constant 0 : i32
    return %arg0, %c0_i32, %c0_i32_0 : i32, i32, i32
  }
  func.func @transform_1(%arg0: i32) -> (i32, i32, i32) {
    %c0_i32 = arith.constant 0 : i32
    %c0_i32_0 = arith.constant 0 : i32
    %c0_i32_1 = arith.constant 0 : i32
    return %arg0, %c0_i32, %c0_i32_0 : i32, i32, i32
  }
  func.func @transform_2(%arg0: i32) -> (i32, i32, i32) {
    %c0_i32 = arith.constant 0 : i32
    %c0_i32_0 = arith.constant 0 : i32
    %c0_i32_1 = arith.constant 0 : i32
    %c0_i32_2 = arith.constant 0 : i32
    return %c0_i32, %c0_i32_0, %c0_i32_1 : i32, i32, i32
  }
  func.func @transform_3(%arg0: i32) -> (i32, i32) {
    %c0_i32 = arith.constant 0 : i32
    %c0_i32_0 = arith.constant 0 : i32
    %c0_i32_1 = arith.constant 0 : i32
    return %c0_i32, %c0_i32_0 : i32, i32
  }
  func.func @transform_4(%arg0: i32) -> (i32, i32) {
    %c0_i32 = arith.constant 0 : i32
    %c0_i32_0 = arith.constant 0 : i32
    %c0_i32_1 = arith.constant 0 : i32
    return %c0_i32, %c0_i32_0 : i32, i32
  }
  func.func @transform_5(%arg0: i32) -> (i32, i32) {
    %c0_i32 = arith.constant 0 : i32
    %c0_i32_0 = arith.constant 0 : i32
    %c0_i32_1 = arith.constant 0 : i32
    return %c0_i32, %c0_i32_0 : i32, i32
  }
  func.func @transform_6(%arg0: i32) -> (i32, i32) {
    %c0_i32 = arith.constant 0 : i32
    %c0_i32_0 = arith.constant 0 : i32
    %c0_i32_1 = arith.constant 0 : i32
    return %c0_i32, %c0_i32_0 : i32, i32
  }
  func.func @transform_7(%arg0: i32) -> (i32, i32, i32) {
    %c0_i32 = arith.constant 0 : i32
    %c0_i32_0 = arith.constant 0 : i32
    %c0_i32_1 = arith.constant 0 : i32
    %c0_i32_2 = arith.constant 0 : i32
    return %c0_i32, %c0_i32_0, %c0_i32_1 : i32, i32, i32
  }
  func.func @transform_8(%arg0: i32) -> (i32, i32) {
    %c0_i32 = arith.constant 0 : i32
    %c0_i32_0 = arith.constant 0 : i32
    %c0_i32_1 = arith.constant 0 : i32
    return %c0_i32, %c0_i32_0 : i32, i32
  }
  func.func @transform_9(%arg0: i32) -> (i32, i32) {
    %c0_i32 = arith.constant 0 : i32
    %c0_i32_0 = arith.constant 0 : i32
    %c0_i32_1 = arith.constant 0 : i32
    return %c0_i32, %c0_i32_0 : i32, i32
  }
  func.func @transform_10(%arg0: i32) -> (i32, i32, i32) {
    %c0_i32 = arith.constant 0 : i32
    %c0_i32_0 = arith.constant 0 : i32
    %c0_i32_1 = arith.constant 0 : i32
    return %arg0, %c0_i32, %c0_i32_0 : i32, i32, i32
  }
}

</mosaic_0001>

<bundles_post_ra>
// kernel: tpu_custom_call.1
= control target key start
LH: loop header
LB: loop body
LE: loop exit
PB: predicated region body
PF: predicated region fallthrough
CT: control target
= control target key end

     0   :  { %15 = vsyncpa [#allocation3], 0  ;;  %s4464_s0 = inlined_call_operand.vmem [shape: f32[2,32,16], index: 0, kind: input, shape index: {}]   ;;  %s4465_s1 = inlined_call_operand.vmem [shape: f32[2,16,32], index: 1, kind: input, shape index: {}]   ;;  %s4466_s2 = inlined_call_operand.vmem [shape: f32[3,16,16], index: 2, kind: input, shape index: {}]   ;;  %s4467_s3 = inlined_call_operand.vmem [shape: f32[288,32], index: 3, kind: input, shape index: {}]   ;;  %s4468_s4 = inlined_call_operand.vmem [shape: f32[288,1], index: 4, kind: input, shape index: {}]   ;;  %s4469_s5 = inlined_call_operand.vmem [shape: f32[32,288], index: 5, kind: input, shape index: {}]   ;;  %s4470_s6 = inlined_call_operand.vmem [shape: f32[1,288], index: 6, kind: input, shape index: {}]   ;;  %s4471_s7 = inlined_call_operand.vmem [shape: f32[3,32,128], index: 7, kind: input, shape index: {}]   ;;  %s4472_s8 = inlined_call_operand.vmem [shape: f32[32,128], index: 8, kind: input, shape index: {}]   ;;  %s4473_s9 = inlined_call_operand.vmem [shape: f32[1,128], index: 9, kind: input, shape index: {}]   ;;  %s4474_s10 = inlined_call_operand.hbm [shape: f32[2,16,128], index: 10, kind: output, shape index: {}]  }
   0x1   :  { %17 = vsyncpa [#allocation3 + $0x1], 0  ;;  %s3714_s13 = smov 0   ;;  %s3716_s14 = smov 0  }
   0x2   :  { %s3718_s15 = smov 0   ;;  %s3720_s16 = smov 0  }
   0x3 LB: > { %s3735_s17 = sadd.s32 4294967295, %s3649_s16   ;;  %s2845_s18 = sadd.s32 4294967294, %s3649_s16   ;;  %s3649_s16 = sphi %s3720_s16, %s4483_s16   ;;  %s3645_s15 = sphi %s3718_s15, %s4482_s15   ;;  %s3641_s14 = sphi %s3716_s14, %s4481_s14   ;;  %s3637_s13 = sphi %s3714_s13, %s4480_s13  }
   0x4   : > { %s3739_s19 = sadd.s32 1, %s3649_s16   ;;  %s250_s20 = sadd.s32 1, %s3645_s15 }
   0x5   : > { %s247_s21 = ssub.s32 %s3649_s16, %s3739_s19  ;;  %p260_p0 = scmp.ne.s32.totalorder %s3645_s15, %s3641_s14 }
   0x6   : > { %p248_p1 = scmp.eq.s32.totalorder %s247_s21, 0  ;;  %p261_p2 = scmp.eq.s32.totalorder %s3735_s17, 1 }
   0x7   : > { %p266_p3 = scmp.ne.s32.totalorder %s3641_s14, %s3637_s13  ;;  %p267_p4 = scmp.eq.s32.totalorder %s2845_s18, 1 }
   0x8   : > { %s3750_s22 = scalar_select %p248_p1, %s3645_s15, %s250_s20  }
   0x9   : > { %p3752_p5 = por %p261_p2, %p260_p0  ;;  %p3756_p6 = por %p267_p4, %p266_p3 }
   0xa   : > { %p2848_p7 = scmp.ge.s32.totalorder %s3649_s16, 1  ;;  %p325_p8 = scmp.lt.s32.totalorder %s3649_s16, 3 }
   0xc   : > { %p326_p9 = pnand %p2848_p7, %p325_p8 }
   0xd   : > { %v991_v0 = vld [vmem:[%s4469_s5 + $0x8] sm:$0xff] (!%p326_p9)  ;;  %v994_v1 = vld [vmem:[%s4469_s5 + $0x20] sm:$0xff] (!%p326_p9)  ;;  %p368_p10 = scmp.lt.s32.totalorder (!%p326_p9), %s3735_s17, 1  ;;  %v993_v4 = vld [vmem:[%s4469_s5 + $0x18] sm:$0xff] (!%p326_p9)  ;;  %v3651_v7 = vmov (!%p326_p9), 0.0   ;;  %vm636_vm0 = vcmask (!%p326_p9), 261120   ;;  %v1004_v52 = vlaneseq (!%p326_p9) }
   0xe   : > { %329 = sbr.rel (%p326_p9) target bundleno = 2877 (0xb3d), region = 60  ;;  %v990_v2 = vld [vmem:[%s4469_s5] sm:$0xff] (!%p326_p9)  ;;  %v3328_v3 = vpack.c.bf16 (!%p326_p9), %v994_v1, %v991_v0  ;;  %v997_v5 = vld [vmem:[%s4469_s5 + $0x38] sm:$0xff] (!%p326_p9)  ;;  %v1000_v6 = vld [vmem:[%s4469_s5 + $0x50] sm:$0xff] (!%p326_p9)  ;;  %1089 = vmatprep.mubr.f32.mxu1 (!%p326_p9), %v3651_v7  ;;  %v3652_v13 = vmov (!%p326_p9), 0   ;;  %vm1266_vm1 = vcmask (!%p326_p9), 130048  }
   0xf   : > { %v3330_v8 = vpack.c.bf16 (!%p326_p9), %v993_v4, %v990_v2  ;;  %v3332_v9 = vpack.c.bf16 (!%p326_p9), %v1000_v6, %v997_v5  ;;  %v996_v10 = vld [vmem:[%s4469_s5 + $0x30] sm:$0xff] (!%p326_p9)  ;;  %v999_v11 = vld [vmem:[%s4469_s5 + $0x48] sm:$0xff] (!%p326_p9)  ;;  %v384_v12 = vld [vmem:[%s4467_s3] sm:$0xff] (!%p326_p9)  ;;  %3512 = vset.pattern.permute.xlu0 (!%p326_p9), %v3652_v13  ;;  %3513 = vset.pattern.permute.xlu1 (!%p326_p9), %v3652_v13  ;;  %v3902_v53 = vshrl.u32 (!%p326_p9), %v1004_v52, 7  ;;  %s2946_s11 = sshll.u32 (!%p326_p9), %s3735_s17, 8 }
  0x10   : > { %3329 = vmatprep.subr.bf16.mxu1 (!%p326_p9), %v3328_v3  ;;  %3091 = vmatprep.mubr.msk.f32.mxu0 (!%p326_p9), %vm636_vm0, %v384_v12  ;;  %v3334_v14 = vpack.c.bf16 (!%p326_p9), %v999_v11, %v996_v10  ;;  %v420_v15 = vld [vmem:[%s4468_s4] sm:$0xff] (!%p326_p9)  ;;  %v422_v23 = vld [vmem:[%s4468_s4 + $0x10] sm:$0xff] (!%p326_p9)  ;;  %v421_v24 = vld [vmem:[%s4468_s4 + $0x8] sm:$0xff] (!%p326_p9) }
  0x11   : > { %3331 = vmatpush1.bf16.msra.mxu1 (!%p326_p9), %v3330_v8  ;;  %458 = vperm.xlu0 (!%p326_p9), %3512, %v420_v15   ;;  %v423_v25 = vld [vmem:[%s4468_s4 + $0x18] sm:$0xff] (!%p326_p9)  ;;  %v424_v26 = vld [vmem:[%s4468_s4 + $0x20] sm:$0xff] (!%p326_p9)  ;;  %v992_v28 = vld [vmem:[%s4469_s5 + $0x10] sm:$0xff] (!%p326_p9)  ;;  %v1006_v54 = vsub.s32 (!%p326_p9), 0, %v3902_v53 }
  0x12   : > { %3333 = vmatprep.subr.bf16.mxu1 (!%p326_p9), %v3332_v9  ;;  %468 = vperm.xlu1 (!%p326_p9), %3513, %v422_v23   ;;  %v995_v29 = vld [vmem:[%s4469_s5 + $0x28] sm:$0xff] (!%p326_p9)  ;;  %v998_v30 = vld [vmem:[%s4469_s5 + $0x40] sm:$0xff] (!%p326_p9)  ;;  %v1001_v31 = vld [vmem:[%s4469_s5 + $0x58] sm:$0xff] (!%p326_p9) }
  0x13   : > { %v385_v32 = vld [vmem:[%s4467_s3 + $0x8] sm:$0xff] (!%p326_p9)  ;;  %v3336_v34 = vpack.c.bf16 (!%p326_p9), %v995_v29, %v992_v28  ;;  %v386_v35 = vld [vmem:[%s4467_s3 + $0x10] sm:$0xff] (!%p326_p9)  ;;  %v3340_v37 = vpack.c.bf16 (!%p326_p9), %v1001_v31, %v998_v30  ;;  %v387_v38 = vld [vmem:[%s4467_s3 + $0x18] sm:$0xff] (!%p326_p9) }
  0x14   : > { %v425_v33 = vld [vmem:[%s4468_s4 + $0x28] sm:$0xff] (!%p326_p9)  ;;  %v426_v36 = vld [vmem:[%s4468_s4 + $0x30] sm:$0xff] (!%p326_p9)  ;;  %v427_v39 = vld [vmem:[%s4468_s4 + $0x38] sm:$0xff] (!%p326_p9) }
  0x15   : > { %s369_s30 = scalar_select %p368_p10, %s3735_s17, 1  ;;  %3335 = vmatpush1.bf16.msra.mxu1 %v3334_v14  ;;  %463 = vperm.xlu0 %3512, %v421_v24   ;;  %v388_v40 = vld [vmem:[%s4467_s3 + $0x20] sm:$0xff]  ;;  %v389_v42 = vld [vmem:[%s4467_s3 + $0x28] sm:$0xff]  ;;  %v390_v44 = vld [vmem:[%s4467_s3 + $0x30] sm:$0xff] }
  0x16   : > { %473 = vperm.xlu1 %3513, %v423_v25   ;;  %3337 = vmatprep.subr.bf16.mxu1 %v3336_v34  ;;  %v428_v41 = vld [vmem:[%s4468_s4 + $0x40] sm:$0xff]  ;;  %v429_v43 = vld [vmem:[%s4468_s4 + $0x48] sm:$0xff]  ;;  %v430_v45 = vld [vmem:[%s4468_s4 + $0x50] sm:$0xff] }
  0x17   : > { %s2944_s18 = sshll.u32 %s369_s30, 5  ;;  %s2945_s20 = sshll.u32 %s369_s30, 4  ;;  %v391_v46 = vld [vmem:[%s4467_s3 + $0x38] sm:$0xff]  ;;  %v392_v48 = vld [vmem:[%s4467_s3 + $0x40] sm:$0xff]  ;;  %v393_v49 = vld [vmem:[%s4467_s3 + $0x48] sm:$0xff] }
  0x18   : > { %s372_s26 = scalar_lea.vmem %s4464_s0, %s2944_s18  ;;  %s377_s29 = scalar_lea.vmem %s4465_s1, %s2945_s20  ;;  %v431_v47 = vld [vmem:[%s4468_s4 + $0x58] sm:$0xff]  ;;  %v394_v50 = vld [vmem:[%s4467_s3 + $0x50] sm:$0xff]  ;;  %v3908_v55 = vld [vmem:[%s4470_s6] sm:$0x7] }
  0x19   : > { %v378_v16 = vld [vmem:[%s372_s26] sm:$0xff]  ;;  %v379_v17 = vld [vmem:[%s372_s26 + $0x8] sm:$0xff]  ;;  %v380_v19 = vld [vmem:[%s372_s26 + $0x10] sm:$0xff]  ;;  %478 = vperm.xlu0 %3512, %v424_v26   ;;  %v1007_v57 = vrot.slane %v3908_v55, %v1006_v54  ;;  %s3653_s30 = smov 96   ;;  %s3654_s18 = smov 64  }
  0x1a   : > { %v3320_v18 = vpack.c.bf16 %v379_v17, %v378_v16  ;;  %v381_v20 = vld [vmem:[%s372_s26 + $0x18] sm:$0xff]  ;;  %v3801_v21 = vld [vmem:[%s377_s29] sm:$0xff]  ;;  %v3817_v27 = vld [vmem:[%s377_s29 + $0x8] sm:$0xff]  ;;  %483 = vperm.xlu1 %3513, %v425_v33   ;;  %s4475_s26 = smov 32   ;;  %s4421_s20 = scalar_lea.hbm %s4474_s10, %s2946_s11 }
  0x1b   : > { %v3324_v22 = vpack.c.bf16 %v381_v20, %v380_v19  ;;  %2890 = vmatmul.mubr.msk.f32.vlgmr.msra.gmra.mrb[0].mxu1 %vm636_vm0, %v3801_v21  ;;  %v395_v51 = vld [vmem:[%s4467_s3 + $0x58] sm:$0xff] }
  0x1c   : > { %3321 = vmatprep.subr.bf16.mxu0 %v3320_v18  ;;  %1095 = vmatprep.mubr.f32.mxu1 %v3651_v7 }
  0x1d   : > { %3323 = vmatpush3.bf16.msra.mxu0 %v3320_v18  ;;  %488 = vperm.xlu0 %3512, %v426_v36  }
  0x1e   : > { %3325 = vmatprep.subr.bf16.mxu0 %v3324_v22  ;;  %3339 = vmatpush3.bf16.msra.mxu1 %v3336_v34 }
  0x1f   : > { %2891 = vmatmul.mubr.msk.f32.gmra.mrb[2].mxu1 %vm636_vm0, %v3817_v27  ;;  %3341 = vmatprep.subr.bf16.mxu1 %v3340_v37 }
  0x20   : > { %3153 = vmatprep.mubr.msk.f32.mxu1 %vm636_vm0, %v3801_v21  ;;  %493 = vperm.xlu1 %3513, %v427_v39  }
  0x21   : > { %3327 = vmatpush3.bf16.msra.mxu0 %v3324_v22  ;;  %498 = vperm.xlu0 %3512, %v428_v41  }
  0x22   : > { %3343 = vmatpush3.bf16.msra.mxu1 %v3340_v37 }
  0x24   : > { %3092 = vmatmul.mubr.msk.f32.vlgmr.msra.gmra.mrb[0].mxu0 %vm636_vm0, %v385_v32  ;;  %503 = vperm.xlu1 %3513, %v429_v43  }
  0x25   : > { %3094 = vmatprep.mubr.msk.f32.mxu0 %vm636_vm0, %v386_v35  ;;  %508 = vperm.xlu0 %3512, %v430_v45  }
  0x26   : > { %3154 = vmatmul.mubr.msk.f32.vlgmr.msra.gmra.mrb[4].mxu1 %vm636_vm0, %v3817_v27 }
  0x28   : > { %3095 = vmatmul.mubr.msk.f32.gmra.mrb[2].mxu0 %vm636_vm0, %v387_v38  ;;  %513 = vperm.xlu1 %3513, %v431_v47  }
  0x29   : > { %3097 = vmatprep.mubr.msk.f32.mxu0 %vm636_vm0, %v388_v40 }
  0x2c   : > { %3098 = vmatmul.mubr.msk.f32.gmra.mrb[4].mxu0 %vm636_vm0, %v389_v42 }
  0x2d   : > { %3100 = vmatprep.mubr.msk.f32.mxu0 %vm636_vm0, %v390_v44 }
  0x30   : > { %3101 = vmatmul.mubr.msk.f32.gmra.mrb[6].mxu0 %vm636_vm0, %v391_v46 }
  0x31   : > { %3103 = vmatprep.mubr.msk.f32.mxu0 %vm636_vm0, %v392_v48  ;;  %v3940_v48 = vpack.c.bf16 %v3817_v27, %v3801_v21 }
  0x34   : > { %3104 = vmatmul.mubr.msk.f32.gmra.mrb[8].mxu0 %vm636_vm0, %v393_v49 }
  0x35   : > { %3106 = vmatprep.mubr.msk.f32.mxu0 %vm636_vm0, %v394_v50 }
  0x38   : > { %3107 = vmatmul.mubr.msk.f32.gmra.mrb[10].mxu0 %vm636_vm0, %v395_v51 }
  0x90   : > { %v459_v58 = vpop.permute.xlu0 %458 }
  0x91   : > { %v469_v56 = vpop.permute.xlu1 %468 }
  0x94   : > { %v464_v63 = vpop.permute.xlu0 %463 }
  0x95   : > { %v474_v62 = vpop.permute.xlu1 %473 }
  0x98   : > { %v479_v7 = vpop.permute.xlu0 %478 }
  0x99   : > { %v484_v4 = vpop.permute.xlu1 %483 }
  0x9c   : > { %v489_v15 = vpop.permute.xlu0 %488 }
  0x9f   : > { %v494_v14 = vpop.permute.xlu1 %493 }
  0xa0   : > { %v499_v29 = vpop.permute.xlu0 %498 }
  0xa3   : > { %v504_v26 = vpop.permute.xlu1 %503 }
  0xa4   : > { %v509_v38 = vpop.permute.xlu0 %508 }
  0xa7   : > { %v514_v37 = vpop.permute.xlu1 %513 }
  0xee   : > { %v1091_v59 = vpop.f32.mrb[0].mxu1 }
  0xef   : > { %v3911_v60 = vadd.f32 %v1091_v59, %v1007_v57  ;;  %v3913_v61 = vpop.f32.mrb[1].mxu1  ;;  %v397_v59 = vld [vmem:[%s4467_s3 + $0x68] sm:$0xff] }
  0xf1   : > { %1291 = vrot.lane.b32.xlu0 %v3911_v60, %s3653_s30  ;;  %3164 = vmatprep.mubr.msk.f32.mxu1 %vm636_vm0, %v3911_v60 }
  0xf2   : > { %v1097_v0 = vpop.f32.mrb[2].mxu1 }
  0xf3   : > { %v3919_v1 = vadd.f32 %v1097_v0, %v1007_v57  ;;  %v3921_v2 = vpop.f32.mrb[3].mxu1  ;;  %v400_v0 = vld [vmem:[%s4467_s3 + $0x80] sm:$0xff] }
  0xf5   : > { %1293 = vrot.lane.b32.xlu1 %v3919_v1, %s3653_s30  ;;  %1400 = vrot.lane.b32.xlu0 %v3911_v60, %s3654_s18 }
  0xf7   : > { %v3093_v3 = vpop.f32.mrb[0].mxu0 }
  0xf8   : > { %v817_v5 = vadd.f32 %v3093_v3, %v464_v63  ;;  %v811_v6 = vpop.f32.mrb[1].mxu0  ;;  %v399_v63 = vld [vmem:[%s4467_s3 + $0x78] sm:$0xff]  ;;  %v401_v3 = vld [vmem:[%s4467_s3 + $0x88] sm:$0xff] }
  0xf9   : > { %v812_v8 = vadd.f32 %v811_v6, %v459_v58  ;;  %1402 = vrot.lane.b32.xlu1 %v3919_v1, %s3654_s18  ;;  %v3929_v22 = vpop.f32.mrb[4].mxu1  ;;  %v396_v58 = vld [vmem:[%s4467_s3 + $0x60] sm:$0xff] }
  0xfa   : > { %v3931_v23 = vpop.f32.mrb[5].mxu1  ;;  %3109 = vmatprep.mubr.msk.f32.mxu0 %vm636_vm0, %v396_v58  ;;  %v404_v6 = vld [vmem:[%s4467_s3 + $0xa0] sm:$0xff] }
  0xfb   : > { %v3344_v9 = vpack.c.bf16 %v817_v5, %v812_v8  ;;  %v3096_v10 = vpop.f32.mrb[2].mxu0  ;;  %3110 = vmatmul.mubr.msk.f32.gmra.mrb[12].mxu0 %vm636_vm0, %v397_v59  ;;  %v403_v5 = vld [vmem:[%s4467_s3 + $0x98] sm:$0xff]  ;;  %v406_v8 = vld [vmem:[%s4467_s3 + $0xb0] sm:$0xff]  ;;  %v432_v59 = vld [vmem:[%s4468_s4 + $0x60] sm:$0xff] }
  0xfc   : > { %v827_v11 = vadd.f32 %v3096_v10, %v474_v62  ;;  %v821_v12 = vpop.f32.mrb[3].mxu0  ;;  %v398_v62 = vld [vmem:[%s4467_s3 + $0x70] sm:$0xff] }
  0xfd   : > { %v822_v13 = vadd.f32 %v821_v12, %v469_v56  ;;  %3345 = vmatprep.subr.bf16.mxu1 %v3344_v9  ;;  %3112 = vmatprep.mubr.msk.f32.mxu0 %vm636_vm0, %v398_v62 }
  0xfe   : > { %3347 = vmatpush3.bf16.msra.mxu1 %v3344_v9  ;;  %v407_v9 = vld [vmem:[%s4467_s3 + $0xb8] sm:$0xff] }
  0xff   : > { %v3348_v16 = vpack.c.bf16 %v827_v11, %v822_v13  ;;  %v3099_v17 = vpop.f32.mrb[4].mxu0  ;;  %3113 = vmatmul.mubr.msk.f32.gmra.mrb[14].mxu0 %vm636_vm0, %v399_v63 }
 0x100   : > { %v837_v18 = vadd.f32 %v3099_v17, %v484_v4  ;;  %v831_v19 = vpop.f32.mrb[5].mxu0  ;;  %3115 = vmatprep.mubr.msk.f32.mxu0 %vm636_vm0, %v400_v0  ;;  %v402_v4 = vld [vmem:[%s4467_s3 + $0x90] sm:$0xff] }
 0x101   : > { %3349 = vmatprep.subr.bf16.mxu1 %v3348_v16  ;;  %v832_v20 = vadd.f32 %v831_v19, %v479_v7  ;;  %v405_v7 = vld [vmem:[%s4467_s3 + $0xa8] sm:$0xff]  ;;  %v434_v0 = vld [vmem:[%s4468_s4 + $0x70] sm:$0xff] }
 0x102   : > { %3351 = vmatpush3.bf16.msra.mxu1 %v3348_v16 }
 0x103   : > { %v3352_v24 = vpack.c.bf16 %v837_v18, %v832_v20  ;;  %v3102_v25 = vpop.f32.mrb[6].mxu0  ;;  %3116 = vmatmul.mubr.msk.f32.gmra.mrb[16].mxu0 %vm636_vm0, %v401_v3  ;;  %v433_v3 = vld [vmem:[%s4468_s4 + $0x68] sm:$0xff] }
 0x104   : > { %v847_v28 = vadd.f32 %v3102_v25, %v494_v14  ;;  %v841_v30 = vpop.f32.mrb[7].mxu0  ;;  %3118 = vmatprep.mubr.msk.f32.mxu0 %vm636_vm0, %v402_v4 }
 0x105   : > { %3165 = vmatmul.mubr.msk.f32.vlgmr.msra.gmra.mrb[6].mxu1 %vm636_vm0, %v3919_v1  ;;  %v842_v31 = vadd.f32 %v841_v30, %v489_v15  ;;  %3353 = vmatprep.subr.bf16.mxu1 %v3352_v24 }
 0x106   : > { %3355 = vmatpush3.bf16.msra.mxu1 %v3352_v24 }
 0x107   : > { %v3356_v32 = vpack.c.bf16 %v847_v28, %v842_v31  ;;  %v3105_v33 = vpop.f32.mrb[8].mxu0  ;;  %3119 = vmatmul.mubr.msk.f32.gmra.mrb[18].mxu0 %vm636_vm0, %v403_v5 }
 0x108   : > { %v857_v34 = vadd.f32 %v3105_v33, %v504_v26  ;;  %v851_v35 = vpop.f32.mrb[9].mxu0  ;;  %3121 = vmatprep.mubr.msk.f32.mxu0 %vm636_vm0, %v404_v6  ;;  %v435_v6 = vld [vmem:[%s4468_s4 + $0x78] sm:$0xff] }
 0x109   : > { %v852_v36 = vadd.f32 %v851_v35, %v499_v29  ;;  %3357 = vmatprep.subr.bf16.mxu1 %v3356_v32 }
 0x10a   : > { %3359 = vmatpush3.bf16.msra.mxu1 %v3356_v32 }
 0x10b   : > { %v3360_v39 = vpack.c.bf16 %v857_v34, %v852_v36  ;;  %v3108_v40 = vpop.f32.mrb[10].mxu0  ;;  %3122 = vmatmul.mubr.msk.f32.gmra.mrb[20].mxu0 %vm636_vm0, %v405_v7  ;;  %v436_v7 = vld [vmem:[%s4468_s4 + $0x80] sm:$0xff] }
 0x10c   : > { %v867_v41 = vadd.f32 %v3108_v40, %v514_v37  ;;  %v861_v42 = vpop.f32.mrb[11].mxu0  ;;  %3124 = vmatprep.mubr.msk.f32.mxu0 %vm636_vm0, %v406_v8  ;;  %v408_v8 = vld [vmem:[%s4467_s3 + $0xc0] sm:$0xff] }
 0x10d   : > { %v862_v43 = vadd.f32 %v861_v42, %v509_v38  ;;  %3361 = vmatprep.subr.bf16.mxu1 %v3360_v39 }
 0x10f   : > { %v3364_v44 = vpack.c.bf16 %v867_v41, %v862_v43  ;;  %3125 = vmatmul.mubr.msk.f32.gmra.mrb[22].mxu0 %vm636_vm0, %v407_v9 }
 0x110   : > { %3127 = vmatprep.mubr.msk.f32.mxu0 %vm636_vm0, %v408_v8 }
 0x163   : > { %v1292_v45 = vpop.permute.xlu0 %1291 }
 0x164   : > { %3175 = vmatprep.mubr.msk.f32.mxu1 %vm636_vm0, %v1292_v45 }
 0x167   : > { %v1294_v46 = vpop.permute.xlu1 %1293  ;;  %v1401_v47 = vpop.permute.xlu0 %1400 }
 0x168   : > { %3176 = vmatmul.mubr.msk.f32.vlgmr.msra.gmra.mrb[8].mxu1 %vm636_vm0, %v1294_v46 }
 0x169   : > { %3363 = vmatpush3.bf16.msra.mxu1 %v3360_v39  ;;  %3186 = vmatprep.mubr.msk.f32.mxu1 %vm636_vm0, %v1401_v47 }
 0x16a   : > { %3365 = vmatprep.subr.bf16.mxu1 %v3364_v44 }
 0x16b   : > { %v1403_v49 = vpop.permute.xlu1 %1402 }
 0x16d   : > { %3367 = vmatpush3.bf16.msra.mxu1 %v3364_v44 }
 0x16e   : > { %3369 = vmatprep.subr.bf16.mxu1 %v3940_v48 }
 0x170   : > { %3187 = vmatmul.mubr.msk.f32.vlgmr.msra.gmra.mrb[10].mxu1 %vm636_vm0, %v1403_v49 }
 0x171   : > { %3371 = vmatpush3.bf16.msra.mxu1 %v3940_v48 }
 0x1ce   : > { %v4026_v62 = vpop.f32.mrb[12].mxu0 }
 0x1cf   : > { %v4028_v63 = vpop.f32.mrb[13].mxu0 }
 0x1d2   : > { %v4036_v4 = vpop.f32.mrb[14].mxu0 }
 0x1d3   : > { %v4038_v5 = vpop.f32.mrb[15].mxu0 }
 0x1d6   : > { %v4049_v9 = vpop.f32.mrb[16].mxu0 }
 0x1d8   : > { %v3166_v50 = vpop.f32.mrb[6].mxu1 }
 0x1d9   : > { %v1265_v51 = vmul.f32 0.03125, %v3166_v50  ;;  %v1255_v52 = vpop.f32.mrb[7].mxu1 }
 0x1da   : > { %v1264_v54 = vmul.f32 0.03125, %v1255_v52 }
 0x1db   : > { %v1270_v56 = vsel %vm1266_vm1, %v1265_v51, -inf }
 0x1dc   : > { %1271 = vmax.xlane.f32.xlu1 %v1270_v56  ;;  %v1267_v57 = vsel %vm1266_vm1, %v1264_v54, -inf }
 0x1dd   : > { %1268 = vmax.xlane.f32.xlu0 %v1267_v57 }
 0x23b   : > { %v3177_v10 = vpop.f32.mrb[8].mxu1 }
 0x23c   : > { %v1375_v11 = vmul.f32 0.03125, %v3177_v10  ;;  %v1365_v12 = vpop.f32.mrb[9].mxu1  ;;  %v409_v10 = vld [vmem:[%s4467_s3 + $0xc8] sm:$0xff] }
 0x23d   : > { %v1374_v13 = vmul.f32 0.03125, %v1365_v12  ;;  %v437_v12 = vld [vmem:[%s4468_s4 + $0x88] sm:$0xff]  ;;  %3128 = vmatmul.mubr.msk.f32.gmra.mrb[24].mxu0 %vm636_vm0, %v409_v10 }
 0x23e   : > { %v1379_v14 = vsel %vm1266_vm1, %v1375_v11, -inf }
 0x23f   : > { %1380 = vmax.xlane.f32.xlu0 %v1379_v14  ;;  %v1376_v15 = vsel %vm1266_vm1, %v1374_v13, -inf }
 0x243   : > { %v3188_v16 = vpop.f32.mrb[10].mxu1  ;;  %1377 = vmax.xlane.f32.xlu0 %v1376_v15 }
 0x244   : > { %v1484_v17 = vmul.f32 0.03125, %v3188_v16  ;;  %v1474_v18 = vpop.f32.mrb[11].mxu1  ;;  %v410_v16 = vld [vmem:[%s4467_s3 + $0xd0] sm:$0xff] }
 0x245   : > { %v1483_v19 = vmul.f32 0.03125, %v1474_v18  ;;  %3130 = vmatprep.mubr.msk.f32.mxu0 %vm636_vm0, %v410_v16  ;;  %v411_v18 = vld [vmem:[%s4467_s3 + $0xd8] sm:$0xff] }
 0x246   : > { %v1488_v20 = vsel %vm1266_vm1, %v1484_v17, -inf  ;;  %3131 = vmatmul.mubr.msk.f32.gmra.mrb[26].mxu0 %vm636_vm0, %v411_v18 }
 0x247   : > { %v1485_v24 = vsel %vm1266_vm1, %v1483_v19, -inf  ;;  %1489 = vmax.xlane.f32.xlu0 %v1488_v20  ;;  %v441_v20 = vld [vmem:[%s4468_s4 + $0xa8] sm:$0xff] }
 0x248   : > { %1486 = vmax.xlane.f32.xlu1 %v1485_v24  ;;  %v438_v24 = vld [vmem:[%s4468_s4 + $0x90] sm:$0xff] }
 0x269   : > { %v1272_v25 = vpop.xlane.xlu1 %1271 }
 0x26a   : > { %v1274_v26 = vsub.f32 %v1265_v51, %v1272_v25  ;;  %v1269_v28 = vpop.xlane.xlu0 %1268  ;;  %v412_v25 = vld [vmem:[%s4467_s3 + $0xe0] sm:$0xff] }
 0x26b   : > { %v1273_v29 = vsub.f32 %v1264_v54, %v1269_v28  ;;  %3133 = vmatprep.mubr.msk.f32.mxu0 %vm636_vm0, %v412_v25  ;;  %v439_v28 = vld [vmem:[%s4468_s4 + $0x98] sm:$0xff] }
 0x26c   : > { %v1277_v30 = vmul.f32 1.442695, %v1274_v26  ;;  %v413_v26 = vld [vmem:[%s4467_s3 + $0xe8] sm:$0xff] }
 0x26d   : > { %v1275_v31 = vmul.f32 1.442695, %v1273_v29  ;;  %v442_v29 = vld [vmem:[%s4468_s4 + $0xb0] sm:$0xff]  ;;  %3134 = vmatmul.mubr.msk.f32.gmra.mrb[28].mxu0 %vm636_vm0, %v413_v26 }
 0x26e   : > { %3514 = vpow2.f32 %v1277_v30  ;;  %v1010_v30 = vsub.s32 1, %v3902_v53 }
 0x26f   : > { %3516 = vpow2.f32 %v1275_v31  ;;  %v414_v31 = vld [vmem:[%s4467_s3 + $0xf0] sm:$0xff] }
 0x270   : > { %3136 = vmatprep.mubr.msk.f32.mxu0 %vm636_vm0, %v414_v31 }
 0x278   : > { %v3999_v32 = vpop.eup %3514 }
 0x279   : > { %v4001_v33 = vpop.eup %3516  ;;  %v1282_v34 = vsel %vm1266_vm1, %v3999_v32, 0.0 }
 0x27a   : > { %1283 = vadd.xlane.f32.xlu0 %v1282_v34  ;;  %v1279_v35 = vsel %vm1266_vm1, %v4001_v33, 0.0 }
 0x27b   : > { %1280 = vadd.xlane.f32.xlu1 %v1279_v35  ;;  %v415_v35 = vld [vmem:[%s4467_s3 + $0xf8] sm:$0xff] }
 0x27c   : > { %3137 = vmatmul.mubr.msk.f32.gmra.mrb[30].mxu0 %vm636_vm0, %v415_v35 }
 0x2cc   : > { %v1381_v36 = vpop.xlane.xlu0 %1380 }
 0x2cd   : > { %v1383_v37 = vsub.f32 %v1375_v11, %v1381_v36  ;;  %v4055_v11 = vpop.f32.mrb[17].mxu0 }
 0x2ce   : > { %v4064_v14 = vpop.f32.mrb[18].mxu0 }
 0x2cf   : > { %v1386_v38 = vmul.f32 1.442695, %v1383_v37  ;;  %v4066_v15 = vpop.f32.mrb[19].mxu0  ;;  %v443_v37 = vld [vmem:[%s4468_s4 + $0xb8] sm:$0xff] }
 0x2d0   : > { %v1378_v39 = vpop.xlane.xlu0 %1377 }
 0x2d1   : > { %3518 = vpow2.f32 %v1386_v38  ;;  %v1382_v40 = vsub.f32 %v1374_v13, %v1378_v39  ;;  %v440_v13 = vld [vmem:[%s4468_s4 + $0xa0] sm:$0xff]  ;;  %v1011_v38 = vrot.slane %v3908_v55, %v1010_v30  ;;  %v418_v55 = vld [vmem:[%s4467_s3 + $0x110] sm:$0xff] }
 0x2d2   : > { %v416_v39 = vld [vmem:[%s4467_s3 + $0x100] sm:$0xff] }
 0x2d3   : > { %v1384_v41 = vmul.f32 1.442695, %v1382_v40  ;;  %3139 = vmatprep.mubr.msk.f32.mxu0 %vm636_vm0, %v416_v39  ;;  %v417_v40 = vld [vmem:[%s4467_s3 + $0x108] sm:$0xff] }
 0x2d4   : > { %v1490_v42 = vpop.xlane.xlu0 %1489  ;;  %3140 = vmatmul.mubr.msk.f32.gmra.mrb[32].mxu0 %vm636_vm0, %v417_v40 }
 0x2d5   : > { %3520 = vpow2.f32 %v1384_v41  ;;  %v1487_v43 = vpop.xlane.xlu1 %1486  ;;  %v1492_v44 = vsub.f32 %v1484_v17, %v1490_v42  ;;  %v4071_v17 = vpop.f32.mrb[20].mxu0  ;;  %v4128_v41 = vadd.f32 %v3913_v61, %v1011_v38  ;;  %3142 = vmatprep.mubr.msk.f32.mxu0 %vm636_vm0, %v418_v55  ;;  %v419_v42 = vld [vmem:[%s4467_s3 + $0x118] sm:$0xff]  ;;  %v1590_v61 = vld [vmem:[%s4471_s7] sm:$0xff] }
 0x2d6   : > { %v1491_v45 = vsub.f32 %v1483_v19, %v1487_v43  ;;  %v4077_v19 = vpop.f32.mrb[21].mxu0  ;;  %v1591_v43 = vld [vmem:[%s4471_s7 + $0x8] sm:$0xff] }
 0x2d7   : > { %v1495_v46 = vmul.f32 1.442695, %v1492_v44  ;;  %v4104_v34 = vpop.f32.mrb[22].mxu0 }
 0x2d8   : > { %v1493_v47 = vmul.f32 1.442695, %v1491_v45  ;;  %v4110_v36 = vpop.f32.mrb[23].mxu0  ;;  %3143 = vmatmul.mubr.msk.f32.gmra.mrb[34].mxu0 %vm636_vm0, %v419_v42 }
 0x2d9   : > { %3522 = vpow2.f32 %v1495_v46 }
 0x2da   : > { %3524 = vpow2.f32 %v1493_v47 }
 0x2db   : > { %v4007_v49 = vpop.eup %3518 }
 0x2dc   : > { %v1391_v50 = vsel %vm1266_vm1, %v4007_v49, 0.0 }
 0x2dd   : > { %1392 = vadd.xlane.f32.xlu0 %v1391_v50 }
 0x2df   : > { %v4011_v51 = vpop.eup %3520 }
 0x2e0   : > { %v1388_v52 = vsel %vm1266_vm1, %v4011_v51, 0.0 }
 0x2e1   : > { %1389 = vadd.xlane.f32.xlu1 %v1388_v52 }
 0x2e3   : > { %v4015_v54 = vpop.eup %3522 }
 0x2e4   : > { %v4017_v56 = vpop.eup %3524  ;;  %v1500_v57 = vsel %vm1266_vm1, %v4015_v54, 0.0 }
 0x2e5   : > { %v1497_v58 = vsel %vm1266_vm1, %v4017_v56, 0.0  ;;  %1501 = vadd.xlane.f32.xlu0 %v1500_v57 }
 0x2e6   : > { %1498 = vadd.xlane.f32.xlu1 %v1497_v58 }
 0x2f7   : > { %518 = vperm.xlu1 %3513, %v432_v59  }
 0x2fb   : > { %528 = vperm.xlu1 %3513, %v434_v0   ;;  %523 = vperm.xlu0 %3512, %v433_v3  }
 0x2ff   : > { %533 = vperm.xlu1 %3513, %v435_v6   ;;  %538 = vperm.xlu0 %3512, %v436_v7   ;;  %v1182_v7 = vld [vmem:[%s4466_s2 + $0x8] sm:$0xff] }
 0x303   : > { %543 = vperm.xlu1 %3513, %v437_v12   ;;  %558 = vperm.xlu0 %3512, %v440_v13   ;;  %v1181_v13 = vld [vmem:[%s4466_s2] sm:$0xff] }
 0x307   : > { %563 = vperm.xlu1 %3513, %v441_v20   ;;  %548 = vperm.xlu0 %3512, %v438_v24   ;;  %v1284_v44 = vpop.xlane.xlu0 %1283 }
 0x308   : > { %v1281_v45 = vpop.xlane.xlu1 %1280  ;;  %3526 = vrcp.f32 %v1284_v44 }
 0x309   : > { %3528 = vrcp.f32 %v1281_v45 }
 0x30b   : > { %553 = vperm.xlu1 %3513, %v439_v28   ;;  %568 = vperm.xlu0 %3512, %v442_v29  }
 0x30f   : > { %573 = vperm.xlu1 %3513, %v443_v37   ;;  %1753 = vrot.lane.b32.xlu0 %v3911_v60, %s4475_s26  ;;  %v4143_v60 = vadd.f32 %v3921_v2, %v1011_v38 }
 0x312   : > { %v3527_v52 = vpop.eup %3526 }
 0x313   : > { %1755 = vrot.lane.b32.xlu1 %v3919_v1, %s4475_s26  ;;  %1969 = vrot.lane.b32.xlu0 %v4128_v41, %s3653_s30  ;;  %v3372_v1 = vpack.c.bf16 %v1591_v43, %v1590_v61  ;;  %v3529_v57 = vpop.eup %3528  ;;  %v1288_v0 = vmul.f32 %v3527_v52, %v3999_v32  ;;  %s4479_s26 = smov 32  }
 0x314   : > { %v1286_v8 = vmul.f32 %v3529_v57, %v4001_v33 }
 0x315   : > { %3373 = vmatprep.subr.bf16.mxu1 %v3372_v1 }
 0x316   : > { %v1289_v26 = vadd.f32 %v1286_v8, %v1181_v13 }
 0x317   : > { %1971 = vrot.lane.b32.xlu1 %v4143_v60, %s3653_s30 }
 0x36a   : > { %v1393_v46 = vpop.xlane.xlu0 %1392 }
 0x36b   : > { %3530 = vrcp.f32 %v1393_v46 }
 0x36e   : > { %v1390_v2 = vpop.xlane.xlu1 %1389 }
 0x36f   : > { %3532 = vrcp.f32 %v1390_v2 }
 0x372   : > { %v1502_v47 = vpop.xlane.xlu0 %1501 }
 0x373   : > { %v1499_v50 = vpop.xlane.xlu1 %1498  ;;  %3534 = vrcp.f32 %v1502_v47 }
 0x374   : > { %3536 = vrcp.f32 %v1499_v50 }
 0x375   : > { %v3531_v58 = vpop.eup %3530 }
 0x376   : > { %v1397_v10 = vmul.f32 %v3531_v58, %v4007_v49 }
 0x377   : > { %v519_v59 = vpop.permute.xlu1 %518 }
 0x378   : > { %v872_v3 = vadd.f32 %v4028_v63, %v519_v59  ;;  %v1290_v63 = vadd.f32 %v1288_v0, %v1182_v7 }
 0x379   : > { %v3533_v6 = vpop.eup %3532 }
 0x37a   : > { %v524_v12 = vpop.permute.xlu0 %523  ;;  %v1395_v32 = vmul.f32 %v3533_v6, %v4011_v51  ;;  %v1399_v28 = vadd.f32 %v1397_v10, %v1290_v63  ;;  %v1592_v51 = vld [vmem:[%s4471_s7 + $0x10] sm:$0xff] }
 0x37b   : > { %v529_v16 = vpop.permute.xlu1 %528  ;;  %v877_v18 = vadd.f32 %v4026_v62, %v524_v12 }
 0x37c   : > { %v882_v20 = vadd.f32 %v4038_v5, %v529_v16  ;;  %v1398_v35 = vadd.f32 %v1395_v32, %v1289_v26  ;;  %v1593_v5 = vld [vmem:[%s4471_s7 + $0x18] sm:$0xff] }
 0x37d   : > { %v3535_v24 = vpop.eup %3534  ;;  %v4166_v25 = vpack.c.bf16 %v877_v18, %v872_v3  ;;  %v3376_v55 = vpack.c.bf16 %v1593_v5, %v1592_v51 }
 0x37e   : > { %v3537_v33 = vpop.eup %3536  ;;  %v1506_v49 = vmul.f32 %v3535_v24, %v4015_v54  ;;  %v539_v29 = vpop.permute.xlu0 %538  ;;  %v1180_v24 = vld [vmem:[%s4472_s8 + $0x18] sm:$0xff] }
 0x37f   : > { %v534_v30 = vpop.permute.xlu1 %533  ;;  %v892_v31 = vadd.f32 %v4055_v11, %v539_v29  ;;  %v1504_v62 = vmul.f32 %v3537_v33, %v4017_v56 }
 0x380   : > { %v887_v37 = vadd.f32 %v4036_v4, %v534_v30  ;;  %v1508_v38 = vadd.f32 %v1506_v49, %v1399_v28 }
 0x381   : > { %v1507_v39 = vadd.f32 %v1504_v62, %v1398_v35 }
 0x382   : > { %v4178_v54 = vpack.c.bf16 %v887_v37, %v882_v20  ;;  %v559_v40 = vpop.permute.xlu0 %558  ;;  %v1179_v20 = vld [vmem:[%s4472_s8 + $0x10] sm:$0xff] }
 0x383   : > { %3193 = vmatprep.mubr.msk.f32.mxu1 %vm1266_vm1, %v1507_v39  ;;  %v544_v11 = vpop.permute.xlu1 %543  ;;  %v912_v44 = vadd.f32 %v4077_v19, %v559_v40  ;;  %v3384_v28 = vpack.c.bf16 %v1180_v24, %v1179_v20 }
 0x384   : > { %v897_v56 = vadd.f32 %v4049_v9, %v544_v11  ;;  %3194 = vmatmul.mubr.msk.f32.vlgmr.msra.gmra.mrb[12].mxu1 %vm1266_vm1, %v1508_v38 }
 0x385   : > { %3375 = vmatpush3.bf16.msra.mxu1 %v3372_v1 }
 0x386   : > { %v3396_v42 = vpack.c.bf16 %v897_v56, %v892_v31  ;;  %v549_v61 = vpop.permute.xlu0 %548  ;;  %3377 = vmatprep.subr.bf16.mxu1 %v3376_v55 }
 0x387   : > { %v564_v43 = vpop.permute.xlu1 %563  ;;  %v902_v4 = vadd.f32 %v4066_v15, %v549_v61 }
 0x388   : > { %v917_v45 = vadd.f32 %v4071_v17, %v564_v43 }
 0x389   : > { %3379 = vmatpush3.bf16.msra.mxu1 %v3376_v55 }
 0x38a   : > { %v3404_v46 = vpack.c.bf16 %v917_v45, %v912_v44  ;;  %v569_v2 = vpop.permute.xlu0 %568 }
 0x38b   : > { %v554_v47 = vpop.permute.xlu1 %553  ;;  %v922_v57 = vadd.f32 %v4110_v36, %v569_v2  ;;  %v1178_v36 = vld [vmem:[%s4472_s8 + $0x8] sm:$0xff] }
 0x38c   : > { %v907_v50 = vadd.f32 %v4064_v14, %v554_v47  ;;  %3405 = vmatprep.subr.bf16.mxu0 %v3404_v46  ;;  %v1177_v14 = vld [vmem:[%s4472_s8] sm:$0xff] }
 0x38d   : > { %3407 = vmatpush3.bf16.msra.mxu0 %v3404_v46  ;;  %v3380_v0 = vpack.c.bf16 %v1178_v36, %v1177_v14 }
 0x38e   : > { %v3400_v9 = vpack.c.bf16 %v907_v50, %v902_v4  ;;  %v1754_v1 = vpop.permute.xlu0 %1753 }
 0x38f   : > { %v574_v52 = vpop.permute.xlu1 %573  ;;  %3381 = vmatprep.subr.bf16.mxu1 %v3380_v0 }
 0x390   : > { %v927_v58 = vadd.f32 %v4104_v34, %v574_v52  ;;  %v4197_v34 = vpop.f32.mrb[24].mxu0 }
 0x391   : > { %v4199_v3 = vpop.f32.mrb[25].mxu0 }
 0x392   : > { %v3408_v15 = vpack.c.bf16 %v927_v58, %v922_v57  ;;  %v1970_v59 = vpop.permute.xlu0 %1969  ;;  %v4201_v6 = vpop.f32.mrb[26].mxu0 }
 0x393   : > { %v1756_v19 = vpop.permute.xlu1 %1755  ;;  %3248 = vmatprep.mubr.msk.f32.mxu0 %vm636_vm0, %v1970_v59  ;;  %v4203_v7 = vpop.f32.mrb[27].mxu0 }
 0x394   : > { %3409 = vmatprep.subr.bf16.mxu0 %v3408_v15  ;;  %v4205_v8 = vpop.f32.mrb[28].mxu0 }
 0x395   : > { %3411 = vmatpush3.bf16.msra.mxu0 %v3408_v15  ;;  %v4207_v10 = vpop.f32.mrb[29].mxu0 }
 0x396   : > { %v4209_v12 = vpop.f32.mrb[30].mxu0 }
 0x397   : > { %v1972_v17 = vpop.permute.xlu1 %1971  ;;  %v4211_v13 = vpop.f32.mrb[31].mxu0 }
 0x398   : > { %3249 = vmatmul.mubr.msk.f32.vlgmr.msra.gmra.mrb[36].mxu0 %vm636_vm0, %v1972_v17 }
 0x3a7   : > { %v4213_v16 = vpop.f32.mrb[32].mxu0 }
 0x3a8   : > { %v4215_v18 = vpop.f32.mrb[33].mxu0 }
 0x3ab   : > { %v4217_v32 = vpop.f32.mrb[34].mxu0 }
 0x3ac   : > { %v4219_v63 = vpop.f32.mrb[35].mxu0 }
 0x457   : > { %v3195_v26 = vpop.f32.mrb[12].mxu1 }
 0x458   : > { %v1581_v33 = vpop.f32.mrb[13].mxu1 }
 0x459   : > { %3204 = vmatprep.mubr.msk.f32.mxu1 %vm636_vm0, %v1581_v33 }
 0x45a   : > { %3205 = vmatmul.mubr.msk.f32.vlgmr.msra.gmra.mrb[14].mxu1 %vm636_vm0, %v3195_v26 }
 0x45b   : > { %3383 = vmatpush3.bf16.msra.mxu1 %v3380_v0  ;;  %3215 = vmatprep.mubr.msk.f32.mxu1 %vm636_vm0, %v3801_v21 }
 0x45c   : > { %3385 = vmatprep.subr.bf16.mxu1 %v3384_v28 }
 0x45f   : > { %3387 = vmatpush3.bf16.msra.mxu1 %v3384_v28 }
 0x460   : > { %3389 = vmatprep.subr.bf16.mxu1 %v4166_v25 }
 0x462   : > { %3216 = vmatmul.mubr.msk.f32.vlgmr.msra.gmra.mrb[14].mxu1 %vm636_vm0, %v3817_v27 }
 0x463   : > { %3391 = vmatpush3.bf16.msra.mxu1 %v4166_v25  ;;  %3226 = vmatprep.mubr.msk.f32.mxu1 %vm636_vm0, %v1754_v1 }
 0x464   : > { %3393 = vmatprep.subr.bf16.mxu1 %v4178_v54 }
 0x467   : > { %3395 = vmatpush3.bf16.msra.mxu1 %v4178_v54 }
 0x468   : > { %3397 = vmatprep.subr.bf16.mxu1 %v3396_v42 }
 0x46a   : > { %3227 = vmatmul.mubr.msk.f32.vlgmr.msra.gmra.mrb[16].mxu1 %vm636_vm0, %v1756_v19 }
 0x46b   : > { %3399 = vmatpush3.bf16.msra.mxu1 %v3396_v42  ;;  %3237 = vmatprep.mubr.msk.f32.mxu1 %vm636_vm0, %v4128_v41  ;;  %v3250_v21 = vpop.f32.mrb[36].mxu0 }
 0x46c   : > { %3401 = vmatprep.subr.bf16.mxu1 %v3400_v9  ;;  %v2043_v49 = vpop.f32.mrb[37].mxu0  ;;  %v2053_v40 = vmul.f32 0.03125, %v3250_v21 }
 0x46d   : > { %v2052_v31 = vmul.f32 0.03125, %v2043_v49 }
 0x46e   : > { %v2057_v11 = vsel %vm1266_vm1, %v2053_v40, -inf }
 0x46f   : > { %3403 = vmatpush3.bf16.msra.mxu1 %v3400_v9  ;;  %v2054_v51 = vsel %vm1266_vm1, %v2052_v31, -inf }
 0x470   : > { %3413 = vmatprep.subr.bf16.mxu1 %v3940_v48 }
 0x472   : > { %3238 = vmatmul.mubr.msk.f32.vlgmr.msra.gmra.mrb[18].mxu1 %vm636_vm0, %v4143_v60 }
 0x473   : > { %3415 = vmatpush3.bf16.msra.mxu1 %v3940_v48 }
 0x53d   : > { %v3228_v27 = vpop.f32.mrb[16].mxu1 }
 0x53e   : > { %v1837_v25 = vmul.f32 0.03125, %v3228_v27  ;;  %v1827_v29 = vpop.f32.mrb[17].mxu1  ;;  %v444_v27 = vld [vmem:[%s4468_s4 + $0xc0] sm:$0xff] }
 0x53f   : > { %v1836_v30 = vmul.f32 0.03125, %v1827_v29  ;;  %v445_v29 = vld [vmem:[%s4468_s4 + $0xc8] sm:$0xff] }
 0x540   : > { %v1841_v35 = vsel %vm1266_vm1, %v1837_v25, -inf }
 0x541   : > { %1842 = vmax.xlane.f32.xlu1 %v1841_v35  ;;  %v1838_v62 = vsel %vm1266_vm1, %v1836_v30, -inf  ;;  %v449_v35 = vld [vmem:[%s4468_s4 + $0xe8] sm:$0xff] }
 0x542   : > { %1839 = vmax.xlane.f32.xlu0 %v1838_v62  ;;  %v452_v62 = vld [vmem:[%s4468_s4 + $0x100] sm:$0xff] }
 0x545   : > { %v3239_v5 = vpop.f32.mrb[18].mxu1  ;;  %2055 = vmax.xlane.f32.xlu1 %v2054_v51  ;;  %v453_v51 = vld [vmem:[%s4468_s4 + $0x108] sm:$0xff] }
 0x546   : > { %v1944_v37 = vmul.f32 0.03125, %v3239_v5  ;;  %v1934_v38 = vpop.f32.mrb[19].mxu1  ;;  %v2916_v5 = vld [vmem:[%s4471_s7 + $0x20] sm:$0xff] }
 0x547   : > { %v1943_v39 = vmul.f32 0.03125, %v1934_v38  ;;  %v450_v38 = vld [vmem:[%s4468_s4 + $0xf0] sm:$0xff] }
 0x548   : > { %v1948_v54 = vsel %vm1266_vm1, %v1944_v37, -inf }
 0x549   : > { %1949 = vmax.xlane.f32.xlu0 %v1948_v54  ;;  %v1945_v55 = vsel %vm1266_vm1, %v1943_v39, -inf  ;;  %v451_v54 = vld [vmem:[%s4468_s4 + $0xf8] sm:$0xff] }
 0x54d   : > { %1946 = vmax.xlane.f32.xlu0 %v1945_v55  ;;  %v455_v55 = vld [vmem:[%s4468_s4 + $0x118] sm:$0xff] }
 0x551   : > { %2058 = vmax.xlane.f32.xlu0 %v2057_v11 }
 0x5ce   : > { %v1843_v56 = vpop.xlane.xlu1 %1842 }
 0x5cf   : > { %v1845_v42 = vsub.f32 %v1837_v25, %v1843_v56  ;;  %v1840_v61 = vpop.xlane.xlu0 %1839  ;;  %v446_v25 = vld [vmem:[%s4468_s4 + $0xd0] sm:$0xff] }
 0x5d0   : > { %v1844_v43 = vsub.f32 %v1836_v30, %v1840_v61  ;;  %v447_v30 = vld [vmem:[%s4468_s4 + $0xd8] sm:$0xff] }
 0x5d1   : > { %v1848_v4 = vmul.f32 1.442695, %v1845_v42 }
 0x5d2   : > { %v1846_v44 = vmul.f32 1.442695, %v1844_v43  ;;  %v2056_v45 = vpop.xlane.xlu1 %2055 }
 0x5d3   : > { %3538 = vpow2.f32 %v1848_v4  ;;  %v2060_v47 = vsub.f32 %v2052_v31, %v2056_v45  ;;  %v448_v31 = vld [vmem:[%s4468_s4 + $0xe0] sm:$0xff] }
 0x5d4   : > { %3540 = vpow2.f32 %v1846_v44 }
 0x5d5   : > { %v2062_v57 = vmul.f32 1.442695, %v2060_v47 }
 0x5d6   : > { %v1950_v46 = vpop.xlane.xlu0 %1949 }
 0x5d7   : > { %v1952_v2 = vsub.f32 %v1944_v37, %v1950_v46  ;;  %v2917_v37 = vld [vmem:[%s4471_s7 + $0x28] sm:$0xff] }
 0x5d9   : > { %v1955_v50 = vmul.f32 1.442695, %v1952_v2 }
 0x5da   : > { %v1947_v9 = vpop.xlane.xlu0 %1946 }
 0x5db   : > { %3542 = vpow2.f32 %v1955_v50  ;;  %v1951_v1 = vsub.f32 %v1943_v39, %v1947_v9  ;;  %v4308_v39 = vpack.c.bf16 %v2917_v37, %v2916_v5  ;;  %v2906_v50 = vld [vmem:[%s4466_s2 + $0x10] sm:$0xff]  ;;  %v2907_v9 = vld [vmem:[%s4466_s2 + $0x18] sm:$0xff] }
 0x5dd   : > { %v4251_v52 = vpop.eup %3538  ;;  %v1953_v58 = vmul.f32 1.442695, %v1951_v1  ;;  %3417 = vmatprep.subr.bf16.mxu1 %v4308_v39 }
 0x5de   : > { %v4253_v15 = vpop.eup %3540  ;;  %v2059_v59 = vpop.xlane.xlu0 %2058  ;;  %v1853_v19 = vsel %vm1266_vm1, %v4251_v52, 0.0 }
 0x5df   : > { %3544 = vpow2.f32 %v1953_v58  ;;  %v2061_v17 = vsub.f32 %v2053_v40, %v2059_v59  ;;  %1854 = vadd.xlane.f32.xlu0 %v1853_v19  ;;  %v1850_v14 = vsel %vm1266_vm1, %v4253_v15, 0.0  ;;  %v454_v40 = vld [vmem:[%s4468_s4 + $0x110] sm:$0xff] }
 0x5e0   : > { %1851 = vadd.xlane.f32.xlu1 %v1850_v14  ;;  %3546 = vpow2.f32 %v2062_v57 }
 0x5e1   : > { %v2064_v36 = vmul.f32 1.442695, %v2061_v17 }
 0x5e3   : > { %3548 = vpow2.f32 %v2064_v36 }
 0x5e5   : > { %v4259_v0 = vpop.eup %3542 }
 0x5e6   : > { %v1960_v20 = vsel %vm1266_vm1, %v4259_v0, 0.0 }
 0x5e7   : > { %1961 = vadd.xlane.f32.xlu0 %v1960_v20 }
 0x5e9   : > { %v4263_v24 = vpop.eup %3544 }
 0x5ea   : > { %v1957_v26 = vsel %vm1266_vm1, %v4263_v24, 0.0  ;;  %v4267_v33 = vpop.eup %3546 }
 0x5eb   : > { %1958 = vadd.xlane.f32.xlu1 %v1957_v26  ;;  %v2066_v21 = vsel %vm1266_vm1, %v4267_v33, 0.0 }
 0x5ed   : > { %v4269_v28 = vpop.eup %3548 }
 0x5ee   : > { %v2069_v49 = vsel %vm1266_vm1, %v4269_v28, 0.0 }
 0x5ef   : > { %2067 = vadd.xlane.f32.xlu1 %v2066_v21  ;;  %2070 = vadd.xlane.f32.xlu0 %v2069_v49 }
 0x600   : > { %578 = vperm.xlu1 %3513, %v444_v27  }
 0x604   : > { %588 = vperm.xlu1 %3513, %v446_v25  }
 0x605   : > { %583 = vperm.xlu0 %3512, %v445_v29  }
 0x608   : > { %593 = vperm.xlu1 %3513, %v447_v30  }
 0x609   : > { %598 = vperm.xlu0 %3512, %v448_v31  }
 0x60c   : > { %603 = vperm.xlu1 %3513, %v449_v35  }
 0x60d   : > { %618 = vperm.xlu0 %3512, %v452_v62  }
 0x610   : > { %623 = vperm.xlu1 %3513, %v453_v51  }
 0x611   : > { %608 = vperm.xlu0 %3512, %v450_v38  }
 0x614   : > { %613 = vperm.xlu1 %3513, %v451_v54  }
 0x615   : > { %628 = vperm.xlu0 %3512, %v454_v40  }
 0x618   : > { %633 = vperm.xlu1 %3513, %v455_v55  }
 0x619   : > { %2250 = vrot.lane.b32.xlu0 %v4128_v41, %s3654_s18 }
 0x61c   : > { %2252 = vrot.lane.b32.xlu1 %v4143_v60, %s3654_s18  ;;  %s365_s18 = sand.u32 1, %s3641_s14  }
 0x61d   : > { %2359 = vrot.lane.b32.xlu0 %v4128_v41, %s4479_s26  ;;  %s2849_s25 = sshll.u32 %s365_s18, 4 }
 0x61e   : > { %s367_s30 = scalar_lea.vmem [#allocation2], %s2849_s25  ;;  %s3656_s25 = smov [#allocation2]  }
 0x61f   : > { %s2771_s28 = sshll.u32 %s367_s30, 4  ;;  %s3591_s27 = sshll.u32 %s3656_s25, 4  ;;  %s4416_s28 = int_to_ptr.vmem [resolvable:$true] %s2771_s28  ;;  %s3592_s27 = int_to_ptr.vmem [resolvable:$false] %s3591_s27 }
 0x620   : > { %2361 = vrot.lane.b32.xlu1 %v4143_v60, %s4479_s26  ;;  %s4423_s26 = scalar_lea.sflag [#allocation3], %s365_s18  ;;  %s3587_s17 = scalar_lea.vmem %s4416_s28, 256 }
 0x621   : > { %p3588_p11 = scmp.ne.s32.totalorder %s4416_s28, %s3587_s17  ;;  %s3593_s29 = scalar_lea.vmem %s3592_s27, 512 }
 0x622   : > { %p3594_p0 = scmp.lt.s32.totalorder %s4416_s28, %s3592_s27  ;;  %p3595_p1 = scmp.lt.s32.totalorder %s3593_s29, %s3587_s17 }
 0x623   : > { %p3589_p12 = pnand %p3588_p11, %p3752_p5 }
 0x624   : > { %p3596_p2 = por %p3595_p1, %p3594_p0 }
 0x625   : > { %p3590_p13 = pneg %p3589_p12 }
 0x627   : > { %p3597_p3 = pnand %p3596_p2, %p3590_p13 }
 0x66c   : > { %v1855_v11 = vpop.xlane.xlu0 %1854 }
 0x66d   : > { %v1852_v56 = vpop.xlane.xlu1 %1851 }
 0x66e   : > { %3550 = vrcp.f32 %v1852_v56 }
 0x66f   : > { %3552 = vrcp.f32 %v1855_v11 }
 0x674   : > { %v1962_v42 = vpop.xlane.xlu0 %1961 }
 0x675   : > { %3554 = vrcp.f32 %v1962_v42 }
 0x678   : > { %v1959_v61 = vpop.xlane.xlu1 %1958  ;;  %v3551_v44 = vpop.eup %3550 }
 0x679   : > { %3556 = vrcp.f32 %v1959_v61  ;;  %v3553_v45 = vpop.eup %3552  ;;  %v1857_v41 = vmul.f32 %v3551_v44, %v4253_v15 }
 0x67a   : > { %v1859_v60 = vmul.f32 %v3553_v45, %v4251_v52 }
 0x67b   : > { %v1860_v17 = vadd.f32 %v2906_v50, %v1857_v41 }
 0x67c   : > { %v2068_v43 = vpop.xlane.xlu1 %2067  ;;  %v2071_v4 = vpop.xlane.xlu0 %2070  ;;  %v1861_v14 = vadd.f32 %v2907_v9, %v1859_v60 }
 0x67d   : > { %3558 = vrcp.f32 %v2068_v43 }
 0x67e   : > { %3560 = vrcp.f32 %v2071_v4 }
 0x67f   : > { %v3555_v2 = vpop.eup %3554 }
 0x680   : > { %v579_v46 = vpop.permute.xlu1 %578  ;;  %v1966_v59 = vmul.f32 %v3555_v2, %v4259_v0 }
 0x681   : > { %v932_v19 = vadd.f32 %v4199_v3, %v579_v46  ;;  %v2919_v3 = vld [vmem:[%s4471_s7 + $0x38] sm:$0xff] }
 0x682   : > { %v1968_v0 = vadd.f32 %v1966_v59, %v1861_v14 }
 0x683   : > { %v3557_v47 = vpop.eup %3556 }
 0x684   : > { %v589_v1 = vpop.permute.xlu1 %588  ;;  %v584_v57 = vpop.permute.xlu0 %583  ;;  %v1964_v58 = vmul.f32 %v3557_v47, %v4263_v24  ;;  %v2918_v24 = vld [vmem:[%s4471_s7 + $0x30] sm:$0xff] }
 0x685   : > { %v937_v15 = vadd.f32 %v4197_v34, %v584_v57  ;;  %v942_v25 = vadd.f32 %v4203_v7, %v589_v1  ;;  %v3420_v35 = vpack.c.bf16 %v2919_v3, %v2918_v24 }
 0x686   : > { %v1967_v49 = vadd.f32 %v1964_v58, %v1860_v17 }
 0x687   : > { %v3559_v52 = vpop.eup %3558  ;;  %v3424_v36 = vpack.c.bf16 %v937_v15, %v932_v19 }
 0x688   : > { %v3561_v20 = vpop.eup %3560  ;;  %v594_v26 = vpop.permute.xlu1 %593  ;;  %v2073_v27 = vmul.f32 %v3559_v52, %v4267_v33 }
 0x689   : > { %v599_v21 = vpop.permute.xlu0 %598  ;;  %v2075_v34 = vmul.f32 %v3561_v20, %v4269_v28  ;;  %v947_v29 = vadd.f32 %v4201_v6, %v594_v26  ;;  %3425 = vmatprep.subr.bf16.mxu0 %v3424_v36 }
 0x68a   : > { %3427 = vmatpush3.bf16.msra.mxu0 %v3424_v36  ;;  %v2076_v30 = vadd.f32 %v2073_v27, %v1967_v49  ;;  %v952_v5 = vadd.f32 %v4207_v10, %v599_v21 }
 0x68b   : > { %v3428_v31 = vpack.c.bf16 %v947_v29, %v942_v25  ;;  %v2077_v33 = vadd.f32 %v2075_v34, %v1968_v0 }
 0x68c   : > { %3255 = vmatprep.mubr.msk.f32.mxu1 %vm1266_vm1, %v2076_v30  ;;  %v604_v62 = vpop.permute.xlu1 %603 }
 0x68d   : > { %v619_v51 = vpop.permute.xlu0 %618  ;;  %v957_v37 = vadd.f32 %v4205_v8, %v604_v62  ;;  %3256 = vmatmul.mubr.msk.f32.vlgmr.msra.gmra.mrb[20].mxu1 %vm1266_vm1, %v2077_v33  ;;  %3429 = vmatprep.subr.bf16.mxu0 %v3428_v31 }
 0x68e   : > { %3431 = vmatpush3.bf16.msra.mxu0 %v3428_v31  ;;  %3419 = vmatpush3.bf16.msra.mxu1 %v4308_v39  ;;  %v972_v38 = vadd.f32 %v4215_v18, %v619_v51 }
 0x68f   : > { %v3432_v6 = vpack.c.bf16 %v957_v37, %v952_v5  ;;  %3421 = vmatprep.subr.bf16.mxu1 %v3420_v35 }
 0x690   : > { %v624_v7 = vpop.permute.xlu1 %623 }
 0x691   : > { %v609_v28 = vpop.permute.xlu0 %608  ;;  %v977_v54 = vadd.f32 %v4213_v16, %v624_v7  ;;  %3433 = vmatprep.subr.bf16.mxu0 %v3432_v6 }
 0x692   : > { %3423 = vmatpush3.bf16.msra.mxu1 %v3420_v35  ;;  %v962_v8 = vadd.f32 %v4211_v13, %v609_v28  ;;  %v1014_v13 = vsub.s32 2, %v3902_v53 }
 0x693   : > { %v3440_v40 = vpack.c.bf16 %v977_v54, %v972_v38 }
 0x694   : > { %v614_v10 = vpop.permute.xlu1 %613 }
 0x695   : > { %v629_v55 = vpop.permute.xlu0 %628  ;;  %v967_v11 = vadd.f32 %v4209_v12, %v614_v10  ;;  %3441 = vmatprep.subr.bf16.mxu1 %v3440_v40 }
 0x696   : > { %v982_v56 = vadd.f32 %v4219_v63, %v629_v55 }
 0x697   : > { %v3436_v39 = vpack.c.bf16 %v967_v11, %v962_v8 }
 0x698   : > { %v634_v42 = vpop.permute.xlu1 %633 }
 0x699   : > { %v2251_v61 = vpop.permute.xlu0 %2250  ;;  %v987_v43 = vadd.f32 %v4217_v32, %v634_v42  ;;  %v3586_v32 = vld [vmem:[%s4470_s6] sm:$0x7]  ;;  %v2934_v42 = vld [vmem:[%s4471_s7 + $0x50] sm:$0xff] }
 0x69a   : > { %3277 = vmatprep.mubr.msk.f32.mxu0 %vm636_vm0, %v2251_v61  ;;  %v1015_v63 = vrot.slane %v3586_v32, %v1014_v13 }
 0x69b   : > { %v3444_v16 = vpack.c.bf16 %v987_v43, %v982_v56  ;;  %v2932_v56 = vld [vmem:[%s4471_s7 + $0x40] sm:$0xff]  ;;  %v2935_v43 = vld [vmem:[%s4471_s7 + $0x58] sm:$0xff] }
 0x69c   : > { %v2253_v18 = vpop.permute.xlu1 %2252  ;;  %v1169_v46 = vadd.f32 %v3931_v23, %v1015_v63  ;;  %v1174_v53 = vadd.f32 %v3929_v22, %v1015_v63 }
 0x69d   : > { %v2360_v4 = vpop.permute.xlu0 %2359  ;;  %3278 = vmatmul.mubr.msk.f32.vlgmr.msra.gmra.mrb[38].mxu0 %vm636_vm0, %v2253_v18 }
 0x69e   : > { %3435 = vmatpush3.bf16.msra.mxu0 %v3432_v6  ;;  %3288 = vmatprep.mubr.msk.f32.mxu0 %vm636_vm0, %v2360_v4 }
 0x69f   : > { %3437 = vmatprep.subr.bf16.mxu0 %v3436_v39 }
 0x6a0   : > { %v2362_v12 = vpop.permute.xlu1 %2361 }
 0x6a2   : > { %3439 = vmatpush3.bf16.msra.mxu0 %v3436_v39  ;;  %v2933_v39 = vld [vmem:[%s4471_s7 + $0x48] sm:$0xff] }
 0x6a3   : > { %3449 = vmatprep.subr.bf16.mxu0 %v3940_v48  ;;  %v3452_v61 = vpack.c.bf16 %v2933_v39, %v2932_v56 }
 0x6a5   : > { %3289 = vmatmul.mubr.msk.f32.vlgmr.msra.gmra.mrb[40].mxu0 %vm636_vm0, %v2362_v12 }
 0x6a6   : > { %3451 = vmatpush3.bf16.msra.mxu0 %v3940_v48 }
 0x760   : > { %v3257_v44 = vpop.f32.mrb[20].mxu1 }
 0x761   : > { %v2150_v45 = vpop.f32.mrb[21].mxu1 }
 0x762   : > { %3266 = vmatprep.mubr.msk.f32.mxu1 %vm636_vm0, %v2150_v45 }
 0x763   : > { %3267 = vmatmul.mubr.msk.f32.vlgmr.msra.gmra.mrb[14].mxu1 %vm636_vm0, %v3257_v44 }
 0x764   : > { %3443 = vmatpush3.bf16.msra.mxu1 %v3440_v40  ;;  %3299 = vmatprep.mubr.msk.f32.mxu1 %vm636_vm0, %v1169_v46 }
 0x765   : > { %3445 = vmatprep.subr.bf16.mxu1 %v3444_v16 }
 0x768   : > { %3447 = vmatpush3.bf16.msra.mxu1 %v3444_v16  ;;  %v3456_v16 = vpack.c.bf16 %v2935_v43, %v2934_v42 }
 0x769   : > { %3453 = vmatprep.subr.bf16.mxu1 %v3452_v61 }
 0x76b   : > { %3300 = vmatmul.mubr.msk.f32.vlgmr.msra.gmra.mrb[22].mxu1 %vm636_vm0, %v1174_v53 }
 0x76c   : > { %3455 = vmatpush3.bf16.msra.mxu1 %v3452_v61 }
 0x76d   : > { %3457 = vmatprep.subr.bf16.mxu1 %v3456_v16 }
 0x770   : > { %v3279_v48 = vpop.f32.mrb[38].mxu0  ;;  %3459 = vmatpush3.bf16.msra.mxu1 %v3456_v16 }
 0x771   : > { %v2334_v2 = vmul.f32 0.03125, %v3279_v48  ;;  %v2324_v41 = vpop.f32.mrb[39].mxu0 }
 0x772   : > { %v2333_v47 = vmul.f32 0.03125, %v2324_v41  ;;  %v2922_v41 = vld [vmem:[%s4466_s2 + $0x20] sm:$0xff] }
 0x773   : > { %v2338_v60 = vsel %vm1266_vm1, %v2334_v2, -inf }
 0x774   : > { %2339 = vmax.xlane.f32.xlu1 %v2338_v60  ;;  %v2335_v23 = vsel %vm1266_vm1, %v2333_v47, -inf }
 0x775   : > { %2336 = vmax.xlane.f32.xlu0 %v2335_v23 }
 0x778   : > { %v3290_v50 = vpop.f32.mrb[40].mxu0 }
 0x779   : > { %v2433_v9 = vpop.f32.mrb[41].mxu0  ;;  %v2443_v57 = vmul.f32 0.03125, %v3290_v50 }
 0x77a   : > { %v2442_v1 = vmul.f32 0.03125, %v2433_v9 }
 0x77b   : > { %v2447_v22 = vsel %vm1266_vm1, %v2443_v57, -inf }
 0x77c   : > { %v2444_v58 = vsel %vm1266_vm1, %v2442_v1, -inf }
 0x77d   : > { %2445 = vmax.xlane.f32.xlu0 %v2444_v58 }
 0x781   : > { %2448 = vmax.xlane.f32.xlu0 %v2447_v22 }
 0x801   : > { %v2340_v15 = vpop.xlane.xlu1 %2339 }
 0x802   : > { %v2337_v59 = vpop.xlane.xlu0 %2336  ;;  %v2342_v17 = vsub.f32 %v2334_v2, %v2340_v15 }
 0x803   : > { %v2341_v52 = vsub.f32 %v2333_v47, %v2337_v59  ;;  %v2923_v47 = vld [vmem:[%s4466_s2 + $0x28] sm:$0xff] }
 0x804   : > { %v2345_v36 = vmul.f32 1.442695, %v2342_v17 }
 0x805   : > { %v2343_v26 = vmul.f32 1.442695, %v2341_v52 }
 0x806   : > { %3562 = vpow2.f32 %v2345_v36  ;;  %v2938_v36 = vld [vmem:[%s4473_s9] ss:$0 sm:$0xff] }
 0x807   : > { %3564 = vpow2.f32 %v2343_v26 }
 0x80a   : > { %v2446_v19 = vpop.xlane.xlu0 %2445 }
 0x80b   : > { %v2450_v21 = vsub.f32 %v2442_v1, %v2446_v19 }
 0x80d   : > { %v2452_v27 = vmul.f32 1.442695, %v2450_v21 }
 0x80e   : > { %v2449_v14 = vpop.xlane.xlu0 %2448 }
 0x80f   : > { %v2451_v20 = vsub.f32 %v2443_v57, %v2449_v14 }
 0x810   : > { %v3563_v29 = vpop.eup %3562 }
 0x811   : > { %v2454_v49 = vmul.f32 1.442695, %v2451_v20  ;;  %v3565_v31 = vpop.eup %3564  ;;  %v2350_v33 = vsel %vm1266_vm1, %v3563_v29, 0.0 }
 0x812   : > { %v2347_v62 = vsel %vm1266_vm1, %v3565_v31, 0.0 }
 0x813   : > { %3566 = vpow2.f32 %v2454_v49 }
 0x814   : > { %3568 = vpow2.f32 %v2452_v27 }
 0x81d   : > { %v3567_v35 = vpop.eup %3566 }
 0x81e   : > { %v3569_v51 = vpop.eup %3568  ;;  %v2459_v5 = vsel %vm1266_vm1, %v3567_v35, 0.0 }
 0x81f   : > { %v2456_v37 = vsel %vm1266_vm1, %v3569_v51, 0.0 }
 0x83e   : > { %v3301_v24 = vpop.f32.mrb[22].mxu1 }
 0x83f   : > { %v2550_v3 = vmul.f32 0.03125, %v3301_v24  ;;  %v2540_v0 = vpop.f32.mrb[23].mxu1 }
 0x840   : > { %v2549_v34 = vmul.f32 0.03125, %v2540_v0 }
 0x841   : > { %v2554_v25 = vsel %vm1266_vm1, %v2550_v3, -inf }
 0x842   : > { %2555 = vmax.xlane.f32.xlu0 %v2554_v25  ;;  %v2551_v30 = vsel %vm1266_vm1, %v2549_v34, -inf }
 0x843   : > { %2552 = vmax.xlane.f32.xlu1 %v2551_v30 }
 0x846   : > { %2351 = vadd.xlane.f32.xlu0 %v2350_v33 }
 0x847   : > { %2348 = vadd.xlane.f32.xlu1 %v2347_v62 }
 0x84a   : > { %2460 = vadd.xlane.f32.xlu0 %v2459_v5 }
 0x84b   : > { %2457 = vadd.xlane.f32.xlu1 %v2456_v37 }
 0x8cf   : > { %v2556_v6 = vpop.xlane.xlu0 %2555 }
 0x8d0   : > { %v2558_v7 = vsub.f32 %v2550_v3, %v2556_v6  ;;  %v2553_v28 = vpop.xlane.xlu1 %2552 }
 0x8d1   : > { %v2557_v38 = vsub.f32 %v2549_v34, %v2553_v28 }
 0x8d2   : > { %v2561_v54 = vmul.f32 1.442695, %v2558_v7 }
 0x8d3   : > { %v2559_v40 = vmul.f32 1.442695, %v2557_v38  ;;  %v2352_v4 = vpop.xlane.xlu0 %2351 }
 0x8d4   : > { %3570 = vpow2.f32 %v2561_v54  ;;  %v2349_v18 = vpop.xlane.xlu1 %2348 }
 0x8d5   : > { %3572 = vpow2.f32 %v2559_v40 }
 0x8d6   : > { %3574 = vrcp.f32 %v2349_v18 }
 0x8d7   : > { %v2461_v13 = vpop.xlane.xlu0 %2460  ;;  %3576 = vrcp.f32 %v2352_v4 }
 0x8d8   : > { %v2458_v12 = vpop.xlane.xlu1 %2457 }
 0x8d9   : > { %3578 = vrcp.f32 %v2458_v12 }
 0x8da   : > { %3580 = vrcp.f32 %v2461_v13 }
 0x8de   : > { %v3571_v10 = vpop.eup %3570 }
 0x8df   : > { %v3573_v55 = vpop.eup %3572  ;;  %v2566_v8 = vsel %vm1266_vm1, %v3571_v10, 0.0 }
 0x8e0   : > { %2567 = vadd.xlane.f32.xlu0 %v2566_v8  ;;  %v2563_v11 = vsel %vm1266_vm1, %v3573_v55, 0.0  ;;  %v3575_v44 = vpop.eup %3574 }
 0x8e1   : > { %2564 = vadd.xlane.f32.xlu1 %v2563_v11  ;;  %v3577_v45 = vpop.eup %3576  ;;  %v2354_v48 = vmul.f32 %v3575_v44, %v3565_v31 }
 0x8e2   : > { %v2356_v2 = vmul.f32 %v3577_v45, %v3563_v29 }
 0x8e3   : > { %v3579_v46 = vpop.eup %3578  ;;  %v2357_v9 = vadd.f32 %v2922_v41, %v2354_v48 }
 0x8e4   : > { %v3581_v53 = vpop.eup %3580  ;;  %v2463_v60 = vmul.f32 %v3579_v46, %v3569_v51  ;;  %v2358_v57 = vadd.f32 %v2923_v47, %v2356_v2 }
 0x8e5   : > { %v2465_v23 = vmul.f32 %v3581_v53, %v3567_v35 }
 0x8e6   : > { %v2466_v22 = vadd.f32 %v2463_v60, %v2357_v9 }
 0x8e7   : > { %v2467_v19 = vadd.f32 %v2465_v23, %v2358_v57 }
 0x96d   : > { %v2568_v32 = vpop.xlane.xlu0 %2567 }
 0x96e   : > { %3582 = vrcp.f32 %v2568_v32  ;;  %v2565_v63 = vpop.xlane.xlu1 %2564 }
 0x96f   : > { %3584 = vrcp.f32 %v2565_v63 }
 0x978   : > { %v3583_v50 = vpop.eup %3582 }
 0x979   : > { %v3585_v1 = vpop.eup %3584  ;;  %v2572_v58 = vmul.f32 %v3583_v50, %v3571_v10 }
 0x97a   : > { %v2570_v59 = vmul.f32 %v3585_v1, %v3573_v55 }
 0x97b   : > { %v2574_v17 = vadd.f32 %v2572_v58, %v2467_v19 }
 0x97c   : > { %v2573_v15 = vadd.f32 %v2570_v59, %v2466_v22 }
 0x97e   : > { %3306 = vmatprep.mubr.msk.f32.mxu0 %vm1266_vm1, %v2573_v15 }
 0x97f   : > { %3307 = vmatmul.mubr.msk.f32.vlgmr.msra.gmra.mrb[42].mxu0 %vm1266_vm1, %v2574_v17 }
 0xa52   : > { %v3308_v52 = vpop.f32.mrb[42].mxu0 }
 0xa53   : > { %v2647_v14 = vpop.f32.mrb[43].mxu0 }
 0xa54   : > { %3317 = vmatprep.mubr.msk.f32.mxu1 %vm636_vm0, %v2647_v14 }
 0xa55   : > { %3318 = vmatmul.mubr.msk.f32.vlgmr.msra.gmra.mrb[14].mxu1 %vm636_vm0, %v3308_v52 }
 0xb28   : > { %v3319_v20 = vpop.f32.mrb[14].mxu1 }
 0xb29   : > { %v2752_v26 = vadd.f32 %v3319_v20, %v2938_v36  ;;  %v2733_v21 = vpop.f32.mrb[15].mxu1 }
 0xb2a   : > { %v2751_v49 = vadd.f32 %v2938_v36, %v2733_v21 }
 0xb2b   : > { %v2754_v27 = vmax.f32 %v2752_v26, 0.0 }
 0xb2c   : > { %v2753_v24 = vmax.f32 %v2751_v49, 0.0 }
 0xb2d   : > { %2756 = vst [vmem:[%s367_s30 + $0x8] sm:$0xff] %v2754_v27 }
 0xb2e   : > { %2755 = vst [vmem:[%s367_s30] sm:$0xff] %v2753_v24 }
 0xb2f   : > { %3600 = shalt.err (!%p3597_p3)
}
 0xb30   : > { %s3601_s18 = scalar_lea.hbm %s4421_s20, 256  ;;  %s3605_s12 = scalar_lea.hbm %s4474_s10, 512 }
 0xb31   : > { %p3602_p4 = scmp.ne.s32.totalorder %s4421_s20, %s3601_s18  ;;  %p3606_p9 = scmp.lt.u32.totalorder %s4421_s20, %s4474_s10 }
 0xb32   : > { %p3607_p10 = scmp.lt.u32.totalorder %s3605_s12, %s3601_s18  ;;  %p3609_p12 = scmp.lt.u32.totalorder %s3601_s18, %s4421_s20 }
 0xb33   : > { %p3603_p7 = pnand %p3602_p4, %p3752_p5 }
 0xb34   : > { %p3608_p11 = por %p3607_p10, %p3606_p9 }
 0xb35   : > { %p3604_p8 = pneg %p3603_p7 }
 0xb36   : > { %p3610_p13 = por %p3609_p12, %p3608_p11 }
 0xb38   : > { %p3611_p0 = pnand %p3610_p13, %p3604_p8 }
 0xb3a   : > { %3614 = shalt.err (!%p3611_p0)
}
 0xb3b   : > { %s3657_s17 = smov 128   ;;  %s3658_s27 = smov 8  }
 0xb3c   : > { %3466 = dma.vmem_to_hbm [thread:$0]  (%p3752_p5), %s4416_s28, 256, %s4421_s20, %s4423_s26, %s3657_s17, %s3657_s17, %s3658_s27  }
 0xb3d PF: > { %p3472_p1 = scmp.ge.s32.totalorder %s3649_s16, 2  ;;  %s2786_s29 = sand.u32 1, %s3637_s13  }
 0xb3e   : > { %s2787_s18 = scalar_lea.sflag [#allocation3], %s2786_s29 }
 0xb3f   : > { %p3469_p2 = pnand %p3472_p1, %p3756_p6 }
 0xb41   : > { %3632 = dma.done.wait (!%p3469_p2), %s2787_s18, 256  }
 0xb42   : > { %3634 = vsyncadd (!%p3469_p2), %s2787_s18, 4294967040  ;;  %p20_p3 = scmp.ge.s32.totalorder %s3739_s19, 4   ;;  %s4480_s13 = smov %s3641_s14 }
 0xb43   : > { %s4481_s14 = smov %s3645_s15  ;;  %s4482_s15 = smov %s3750_s22 }
 0xb44   : > { %s4483_s16 = smov %s3739_s19  ;;  %22 = sbr.rel (!%p20_p3) target bundleno = 3 (0x3), region = 102 }
 0xb4b   :  { %2792 = vsyncpa [#allocation3], 1 }
 0xb4c   :  { %2794 = vsyncpa [#allocation3 + $0x1], 1 }

</bundles_post_ra>
